<compile_context>
chip_gen: v5e
topology: v5e:2x2
jax: 0.10.0
libtpu: 0.0.40
codegen_flags: <defaults>
</compile_context>

<pallas_src>
import math
import jax
import jax.numpy as jnp
from jax import lax
from jax.experimental import pallas as pl
from jax.experimental.pallas import tpu as pltpu

B, S, E, H = 2, 8, 32, 4              # batch, seq, embed_dim, num_heads
BS = B * S                            # flattened token count
DH = E // H                           # head dim
EP = 128                              # embedding padded to one full lane group
DHP = 128                             # per-head lane group (head slices lane-aligned)
HIDDEN = 4 * E                        # MLP hidden width (= 128: already lane-dense)
EPS = 1e-5                            # nn.LayerNorm default eps
MASK_NEG = -0.5 * float(jnp.finfo(jnp.float32).max)   # dtype-aware large-negative


def _erf(x):
    # Abramowitz & Stegun 7.1.26 (|error| < 1.5e-7): exp/abs/select only, so it
    # lowers on Mosaic; numerically indistinguishable from exact erf at the
    # bf16-operand tolerance used below.
    a1, a2, a3, a4, a5 = 0.254829592, -0.284496736, 1.421413741, -1.453152027, 1.061405429
    ax = jnp.abs(x)
    t = 1.0 / (1.0 + 0.3275911 * ax)
    poly = ((((a5 * t + a4) * t + a3) * t + a2) * t + a1) * t
    y = 1.0 - poly * jnp.exp(-ax * ax)
    return jnp.where(x >= 0, y, -y)


def _gelu_exact(x):
    # nn.GELU() default: exact erf-based gelu.
    return 0.5 * x * (1.0 + _erf(x * (1.0 / math.sqrt(2.0))))


def _ln_stats(x):
    # x is zero-padded beyond column E, so sum(x)/E and sum(x*x)/E give the
    # exact mean / mean-of-squares over the real E columns.
    inv_e = 1.0 / float(E)
    mu = jnp.sum(x, axis=-1, keepdims=True) * inv_e
    ms = jnp.sum(x * x, axis=-1, keepdims=True) * inv_e
    var = ms - mu * mu
    return mu, var


def block_kernel(x_ref, mask_ref,
                 wqkv_ref, bqkv_ref,      # fused head-major QKV (LN affines + q-scale folded)
                 wo_ref, bo_ref,          # attention output projection (head-major rows)
                 wfc_ref, bfc_ref,        # c_fc (ln_2 affine folded in)
                 wproj_ref, bproj_ref,    # c_proj
                 o_ref):
    bf = jnp.bfloat16
    x = x_ref[...]                                            # (BS, EP) f32, cols >= E are 0

    # --- shared LayerNorm statistics (ln_q / ln_k / ln_v all see the same x) ---
    mu, var = _ln_stats(x)
    x_hat = (x - mu) * lax.rsqrt(var + EPS)                   # padded cols hit zero weight rows

    # --- fused QKV projection: one (BS,EP)@(EP,3*H*DHP) bf16 MXU push, f32 acc ---
    qkv = jnp.dot(x_hat.astype(bf), wqkv_ref[...],
                  preferred_element_type=jnp.float32) + bqkv_ref[...]   # (BS, 3*H*DHP) f32
    qkv_bf = qkv.astype(bf)

    # --- head-major stacking: lane-group-aligned slices, sublane-only concat ---
    q_hs = jnp.concatenate([qkv_bf[:, (0 * H + h) * DHP:(0 * H + h + 1) * DHP]
                            for h in range(H)], axis=0)       # (H*BS, DHP) bf16
    k_hs = jnp.concatenate([qkv_bf[:, (1 * H + h) * DHP:(1 * H + h + 1) * DHP]
                            for h in range(H)], axis=0)
    v_hs = jnp.concatenate([qkv_bf[:, (2 * H + h) * DHP:(2 * H + h + 1) * DHP]
                            for h in range(H)], axis=0)

    # --- one block-diagonal score matmul + ONE softmax for all (head, batch) ---
    n = H * BS
    s = lax.dot_general(q_hs, k_hs, (((1,), (1,)), ((), ())),
                        preferred_element_type=jnp.float32)   # (n, n) f32
    s = s + mask_ref[...]                                     # precomputed additive mask
    s = s - jnp.max(s, axis=-1, keepdims=True)
    p = jnp.exp(s)
    p = p * pl.reciprocal(jnp.sum(p, axis=-1, keepdims=True), approx=True)
    o_hs = jnp.dot(p.astype(bf), v_hs,
                   preferred_element_type=jnp.float32)        # (n, DHP) f32
    o_bf = o_hs.astype(bf)

    # --- re-assemble heads along lane groups, ONE output-projection matmul ---
    attn = jnp.concatenate([o_bf[h * BS:(h + 1) * BS, :] for h in range(H)],
                           axis=-1)                           # (BS, H*DHP) bf16
    x1 = x + jnp.dot(attn, wo_ref[...],
                     preferred_element_type=jnp.float32) + bo_ref[...]  # (BS, EP), pad cols stay 0

    # --- MLP branch: ln_2 (affine folded into wfc) -> c_fc -> GELU -> c_proj ---
    mu2, var2 = _ln_stats(x1)
    x1_hat = (x1 - mu2) * lax.rsqrt(var2 + EPS)
    hid = _gelu_exact(jnp.dot(x1_hat.astype(bf), wfc_ref[...],
                              preferred_element_type=jnp.float32) + bfc_ref[...])  # (BS, HIDDEN)
    mlp = jnp.dot(hid.astype(bf), wproj_ref[...],
                  preferred_element_type=jnp.float32) + bproj_ref[...]              # (BS, EP)

    o_ref[...] = (x1 + mlp).astype(o_ref.dtype)               # 2nd residual, lane-dense store


def residual_attention_block(x, fused_params):
    """x: (B, S, E) f32; fused_params: output of fuse_params(). Single kernel call."""
    x2d = x.reshape(BS, E)
    x_pad = jnp.pad(x2d, ((0, 0), (0, EP - E)))               # lane-dense activations
    vmem = pl.BlockSpec(memory_space=pltpu.MemorySpace.VMEM)
    out_pad = pl.pallas_call(
        block_kernel,
        out_shape=jax.ShapeDtypeStruct((BS, EP), jnp.float32),
        in_specs=[vmem] * (1 + len(fused_params)),
        out_specs=vmem,
        compiler_params=pltpu.CompilerParams(vmem_limit_bytes=32 * 1024 * 1024),
    )(x_pad, *fused_params)
    return out_pad[:, :E].reshape(B, S, E)


def fuse_params(params):
    """One-time (init-time) exact weight folding + padding + bf16 cast:
       * ln_q/ln_k/ln_v affines and the 1/sqrt(DH) query scale folded into the
         QKV projection, which is laid out head-major with each head's DH
         columns in its own 128-lane group (zero-padded elsewhere),
       * ln_2 affine folded into c_fc,
       * all weights cast to bf16 (MXU operands); biases kept f32,
       * block-diagonal additive attention mask precomputed."""
    (lnq_w, lnq_b, lnk_w, lnk_b, lnv_w, lnv_b,
     wq, bq, wk, bk, wv, bv, wo, bo,
     ln2_w, ln2_b, wfc, bfc, wproj, bproj) = params

    scale = 1.0 / math.sqrt(DH)
    wq_f = (lnq_w.reshape(E, 1) * wq) * scale
    bq_f = (lnq_b @ wq + bq) * scale
    wk_f = lnk_w.reshape(E, 1) * wk
    bk_f = lnk_b @ wk + bk
    wv_f = lnv_w.reshape(E, 1) * wv
    bv_f = lnv_b @ wv + bv

    # head-major, lane-group-aligned, zero-padded QKV weight/bias
    w_qkv = jnp.zeros((EP, 3 * H * DHP), jnp.float32)
    b_qkv = jnp.zeros((1, 3 * H * DHP), jnp.float32)
    for p_idx, (wp, bp) in enumerate(((wq_f, bq_f), (wk_f, bk_f), (wv_f, bv_f))):
        for h in range(H):
            c0 = (p_idx * H + h) * DHP
            w_qkv = w_qkv.at[:E, c0:c0 + DH].set(wp[:, h * DH:(h + 1) * DH])
            b_qkv = b_qkv.at[:, c0:c0 + DH].set(bp[:, h * DH:(h + 1) * DH])

    # head-major output projection: rows of head h live in lane group h
    wo_h = jnp.zeros((H * DHP, EP), jnp.float32)
    for h in range(H):
        wo_h = wo_h.at[h * DHP:h * DHP + DH, :E].set(wo[h * DH:(h + 1) * DH, :])
    bo_p = jnp.zeros((1, EP), jnp.float32).at[:, :E].set(bo)

    # ln_2 affine folded into c_fc; pad E input rows to EP (HIDDEN=128 already lane-dense)
    wfc_f = ln2_w.reshape(E, 1) * wfc
    bfc_f = ln2_b @ wfc + bfc
    wfc_p = jnp.zeros((EP, HIDDEN), jnp.float32).at[:E, :].set(wfc_f)

    wproj_p = jnp.zeros((HIDDEN, EP), jnp.float32).at[:, :E].set(wproj)
    bproj_p = jnp.zeros((1, EP), jnp.float32).at[:, :E].set(bproj)

    # block-diagonal additive mask: row index = h*BS + b*S + t  ->  i // S = (head, batch)
    grp = jnp.arange(H * BS, dtype=jnp.int32) // S
    mask = jnp.where(grp[:, None] == grp[None, :], 0.0, MASK_NEG).astype(jnp.float32)

    bf = jnp.bfloat16
    return (mask,
            w_qkv.astype(bf), b_qkv,
            wo_h.astype(bf), bo_p,
            wfc_p.astype(bf), bfc_f,
            wproj_p.astype(bf), bproj_p)


def init_params(key):
    """Deterministic synthetic weights. Linear weights stored as (in, out)."""
    keys = jax.random.split(key, 12)

    def w(k, fi, fo, scale=0.05):
        return jax.random.normal(k, (fi, fo), jnp.float32) * scale

    def vec(k, n, scale=0.02):
        return jax.random.normal(k, (1, n), jnp.float32) * scale

    ones_e = jnp.ones((1, E), jnp.float32)
    zeros_e = jnp.zeros((1, E), jnp.float32)

    lnq_w, lnq_b = ones_e, zeros_e
    lnk_w, lnk_b = ones_e, zeros_e
    lnv_w, lnv_b = ones_e, zeros_e
    ln2_w, ln2_b = ones_e, zeros_e

    wq, bq = w(keys[0], E, E), vec(keys[1], E)
    wk, bk = w(keys[2], E, E), vec(keys[3], E)
    wv, bv = w(keys[4], E, E), vec(keys[5], E)
    wo, bo = w(keys[6], E, E), vec(keys[7], E)
    wfc, bfc = w(keys[8], E, HIDDEN), vec(keys[9], HIDDEN)
    wproj, bproj = w(keys[10], HIDDEN, E), vec(keys[11], E)

    return (lnq_w, lnq_b, lnk_w, lnk_b, lnv_w, lnv_b,
            wq, bq, wk, bk, wv, bv, wo, bo,
            ln2_w, ln2_b, wfc, bfc, wproj, bproj)


def reference(x, params):
    """Pure-JAX reference mirroring the PyTorch forward (uses UNFUSED f32 params)."""
    (lnq_w, lnq_b, lnk_w, lnk_b, lnv_w, lnv_b,
     wq, bq, wk, bk, wv, bv, wo, bo,
     ln2_w, ln2_b, wfc, bfc, wproj, bproj) = params

    def ln(t, w_, b_):
        mu = jnp.mean(t, -1, keepdims=True)
        var = jnp.mean((t - mu) ** 2, -1, keepdims=True)
        return (t - mu) / jnp.sqrt(var + EPS) * w_ + b_

    q = ln(x, lnq_w, lnq_b) @ wq + bq
    k = ln(x, lnk_w, lnk_b) @ wk + bk
    v = ln(x, lnv_w, lnv_b) @ wv + bv
    qh = q.reshape(B, S, H, DH).transpose(0, 2, 1, 3) / math.sqrt(DH)
    kh = k.reshape(B, S, H, DH).transpose(0, 2, 1, 3)
    vh = v.reshape(B, S, H, DH).transpose(0, 2, 1, 3)
    s = jnp.einsum('bhqd,bhkd->bhqk', qh, kh)
    p = jax.nn.softmax(s, axis=-1)
    o = jnp.einsum('bhqk,bhkd->bhqd', p, vh).transpose(0, 2, 1, 3).reshape(B, S, E)
    x1 = x + (o @ wo + bo)
    h2 = ln(x1, ln2_w, ln2_b)
    hid = jax.nn.gelu(h2 @ wfc + bfc, approximate=False)
    return x1 + (hid @ wproj + bproj)


if __name__ == "__main__":
    key = jax.random.PRNGKey(0)
    kx, kp = jax.random.split(key)
    x = jax.random.normal(kx, (B, S, E), jnp.float32)
    params = init_params(kp)
    fused = fuse_params(params)          # one-time folding/padding/bf16 cast, not per-call work

    out = residual_attention_block(x, fused)
    out = jax.block_until_ready(out)

    ref = reference(x, params)
    assert out.shape == (B, S, E)
    err = float(jnp.max(jnp.abs(out - ref)))
    # tolerance accounts for bf16 MXU operands, folded-then-rounded weights and
    # the EUP approximate-reciprocal softmax (vs the pure-f32 exact reference)
    assert err < 5e-2, f"mismatch vs pure-JAX reference: max|diff|={err}"

    print("KERNEL_OK")
</pallas_src>

<mosaic_0001>
module attributes {stable_mosaic.version = 11 : i64} {
  func.func @block_kernel(%arg0: memref<16x128xf32, #tpu.memory_space<vmem>>, %arg1: memref<64x64xf32, #tpu.memory_space<vmem>>, %arg2: memref<128x1536xbf16, #tpu.memory_space<vmem>>, %arg3: memref<1x1536xf32, #tpu.memory_space<vmem>>, %arg4: memref<512x128xbf16, #tpu.memory_space<vmem>>, %arg5: memref<1x128xf32, #tpu.memory_space<vmem>>, %arg6: memref<128x128xbf16, #tpu.memory_space<vmem>>, %arg7: memref<1x128xf32, #tpu.memory_space<vmem>>, %arg8: memref<128x128xbf16, #tpu.memory_space<vmem>>, %arg9: memref<1x128xf32, #tpu.memory_space<vmem>>, %arg10: memref<16x128xf32, #tpu.memory_space<vmem>>) attributes {dimension_semantics = [], scalar_prefetch = 0 : i64, scratch_operands = 0 : i64, tpu.core_type = #tpu.core_type<tc>} {
    %c0 = arith.constant 0 : index
    %c0_0 = arith.constant 0 : index
    %0 = vector.load %arg0[%c0, %c0_0] : memref<16x128xf32, #tpu.memory_space<vmem>>, vector<16x128xf32>
    %cst = arith.constant dense<0.000000e+00> : vector<16xf32>
    %1 = vector.multi_reduction <add>, %0, %cst [1] : vector<16x128xf32> to vector<16xf32>
    %2 = vector.shape_cast %1 : vector<16xf32> to vector<16x1xf32>
    %cst_1 = arith.constant 3.125000e-02 : f32
    %3 = vector.broadcast %cst_1 : f32 to vector<16x1xf32>
    %4 = arith.mulf %2, %3 : vector<16x1xf32>
    %5 = arith.mulf %0, %0 : vector<16x128xf32>
    %cst_2 = arith.constant dense<0.000000e+00> : vector<16xf32>
    %6 = vector.multi_reduction <add>, %5, %cst_2 [1] : vector<16x128xf32> to vector<16xf32>
    %7 = vector.shape_cast %6 : vector<16xf32> to vector<16x1xf32>
    %cst_3 = arith.constant 3.125000e-02 : f32
    %8 = vector.broadcast %cst_3 : f32 to vector<16x1xf32>
    %9 = arith.mulf %7, %8 : vector<16x1xf32>
    %10 = arith.mulf %4, %4 : vector<16x1xf32>
    %11 = arith.subf %9, %10 : vector<16x1xf32>
    %12 = vector.broadcast %4 : vector<16x1xf32> to vector<16x128xf32>
    %13 = arith.subf %0, %12 : vector<16x128xf32>
    %cst_4 = arith.constant 9.99999974E-6 : f32
    %14 = vector.broadcast %cst_4 : f32 to vector<16x1xf32>
    %15 = arith.addf %11, %14 : vector<16x1xf32>
    %16 = math.rsqrt %15 : vector<16x1xf32>
    %17 = vector.broadcast %16 : vector<16x1xf32> to vector<16x128xf32>
    %18 = arith.mulf %13, %17 : vector<16x128xf32>
    %19 = arith.truncf %18 : vector<16x128xf32> to vector<16x128xbf16>
    %c0_5 = arith.constant 0 : index
    %c0_6 = arith.constant 0 : index
    %20 = vector.load %arg2[%c0_5, %c0_6] : memref<128x1536xbf16, #tpu.memory_space<vmem>>, vector<128x1536xbf16>
    %cst_7 = arith.constant dense<0.000000e+00> : vector<16x1536xf32>
    %21 = tpu.matmul %19, %20, %cst_7 {dimension_numbers = #tpu.dot_dimension_numbers<[1], [0], [0], [1], [0, 0, 1, 1], [], []>} : vector<16x128xbf16>, vector<128x1536xbf16>, vector<16x1536xf32> -> vector<16x1536xf32>
    %c0_8 = arith.constant 0 : index
    %c0_9 = arith.constant 0 : index
    %22 = vector.load %arg3[%c0_8, %c0_9] : memref<1x1536xf32, #tpu.memory_space<vmem>>, vector<1x1536xf32>
    %23 = vector.broadcast %22 : vector<1x1536xf32> to vector<16x1536xf32>
    %24 = arith.addf %21, %23 : vector<16x1536xf32>
    %25 = arith.truncf %24 : vector<16x1536xf32> to vector<16x1536xbf16>
    %26 = vector.extract_strided_slice %25 {offsets = [0, 0], sizes = [16, 128], strides = [1, 1]} : vector<16x1536xbf16> to vector<16x128xbf16>
    %27 = vector.extract_strided_slice %25 {offsets = [0, 128], sizes = [16, 128], strides = [1, 1]} : vector<16x1536xbf16> to vector<16x128xbf16>
    %28 = vector.extract_strided_slice %25 {offsets = [0, 256], sizes = [16, 128], strides = [1, 1]} : vector<16x1536xbf16> to vector<16x128xbf16>
    %29 = vector.extract_strided_slice %25 {offsets = [0, 384], sizes = [16, 128], strides = [1, 1]} : vector<16x1536xbf16> to vector<16x128xbf16>
    %30 = tpu.concatenate %26, %27, %28, %29 in 0 : vector<16x128xbf16>, vector<16x128xbf16>, vector<16x128xbf16>, vector<16x128xbf16> -> vector<64x128xbf16>
    %31 = vector.extract_strided_slice %25 {offsets = [0, 512], sizes = [16, 128], strides = [1, 1]} : vector<16x1536xbf16> to vector<16x128xbf16>
    %32 = vector.extract_strided_slice %25 {offsets = [0, 640], sizes = [16, 128], strides = [1, 1]} : vector<16x1536xbf16> to vector<16x128xbf16>
    %33 = vector.extract_strided_slice %25 {offsets = [0, 768], sizes = [16, 128], strides = [1, 1]} : vector<16x1536xbf16> to vector<16x128xbf16>
    %34 = vector.extract_strided_slice %25 {offsets = [0, 896], sizes = [16, 128], strides = [1, 1]} : vector<16x1536xbf16> to vector<16x128xbf16>
    %35 = tpu.concatenate %31, %32, %33, %34 in 0 : vector<16x128xbf16>, vector<16x128xbf16>, vector<16x128xbf16>, vector<16x128xbf16> -> vector<64x128xbf16>
    %36 = vector.extract_strided_slice %25 {offsets = [0, 1024], sizes = [16, 128], strides = [1, 1]} : vector<16x1536xbf16> to vector<16x128xbf16>
    %37 = vector.extract_strided_slice %25 {offsets = [0, 1152], sizes = [16, 128], strides = [1, 1]} : vector<16x1536xbf16> to vector<16x128xbf16>
    %38 = vector.extract_strided_slice %25 {offsets = [0, 1280], sizes = [16, 128], strides = [1, 1]} : vector<16x1536xbf16> to vector<16x128xbf16>
    %39 = vector.extract_strided_slice %25 {offsets = [0, 1408], sizes = [16, 128], strides = [1, 1]} : vector<16x1536xbf16> to vector<16x128xbf16>
    %40 = tpu.concatenate %36, %37, %38, %39 in 0 : vector<16x128xbf16>, vector<16x128xbf16>, vector<16x128xbf16>, vector<16x128xbf16> -> vector<64x128xbf16>
    %cst_10 = arith.constant dense<0.000000e+00> : vector<64x64xf32>
    %41 = tpu.matmul %30, %35, %cst_10 {dimension_numbers = #tpu.dot_dimension_numbers<[1], [1], [0], [0], [0, 0, 1, 0], [], []>} : vector<64x128xbf16>, vector<64x128xbf16>, vector<64x64xf32> -> vector<64x64xf32>
    %c0_11 = arith.constant 0 : index
    %c0_12 = arith.constant 0 : index
    %42 = vector.load %arg1[%c0_11, %c0_12] : memref<64x64xf32, #tpu.memory_space<vmem>>, vector<64x64xf32>
    %43 = arith.addf %41, %42 : vector<64x64xf32>
    %cst_13 = arith.constant dense<0xFF800000> : vector<64xf32>
    %44 = vector.multi_reduction <maximumf>, %43, %cst_13 [1] : vector<64x64xf32> to vector<64xf32>
    %45 = vector.shape_cast %44 : vector<64xf32> to vector<64x1xf32>
    %46 = vector.broadcast %45 : vector<64x1xf32> to vector<64x64xf32>
    %47 = arith.subf %43, %46 : vector<64x64xf32>
    %48 = math.exp %47 : vector<64x64xf32>
    %cst_14 = arith.constant dense<0.000000e+00> : vector<64xf32>
    %49 = vector.multi_reduction <add>, %48, %cst_14 [1] : vector<64x64xf32> to vector<64xf32>
    %50 = vector.shape_cast %49 : vector<64xf32> to vector<64x1xf32>
    %51 = tpu.reciprocal %50 {approx = true} : vector<64x1xf32> -> vector<64x1xf32>
    %52 = vector.broadcast %51 : vector<64x1xf32> to vector<64x64xf32>
    %53 = arith.mulf %48, %52 : vector<64x64xf32>
    %54 = arith.truncf %53 : vector<64x64xf32> to vector<64x64xbf16>
    %cst_15 = arith.constant dense<0.000000e+00> : vector<64x128xf32>
    %55 = tpu.matmul %54, %40, %cst_15 {dimension_numbers = #tpu.dot_dimension_numbers<[1], [0], [0], [1], [0, 0, 1, 1], [], []>} : vector<64x64xbf16>, vector<64x128xbf16>, vector<64x128xf32> -> vector<64x128xf32>
    %56 = arith.truncf %55 : vector<64x128xf32> to vector<64x128xbf16>
    %57 = vector.extract_strided_slice %56 {offsets = [0, 0], sizes = [16, 128], strides = [1, 1]} : vector<64x128xbf16> to vector<16x128xbf16>
    %58 = vector.extract_strided_slice %56 {offsets = [16, 0], sizes = [16, 128], strides = [1, 1]} : vector<64x128xbf16> to vector<16x128xbf16>
    %59 = vector.extract_strided_slice %56 {offsets = [32, 0], sizes = [16, 128], strides = [1, 1]} : vector<64x128xbf16> to vector<16x128xbf16>
    %60 = vector.extract_strided_slice %56 {offsets = [48, 0], sizes = [16, 128], strides = [1, 1]} : vector<64x128xbf16> to vector<16x128xbf16>
    %61 = tpu.concatenate %57, %58, %59, %60 in 1 : vector<16x128xbf16>, vector<16x128xbf16>, vector<16x128xbf16>, vector<16x128xbf16> -> vector<16x512xbf16>
    %c0_16 = arith.constant 0 : index
    %c0_17 = arith.constant 0 : index
    %62 = vector.load %arg4[%c0_16, %c0_17] : memref<512x128xbf16, #tpu.memory_space<vmem>>, vector<512x128xbf16>
    %cst_18 = arith.constant dense<0.000000e+00> : vector<16x128xf32>
    %63 = tpu.matmul %61, %62, %cst_18 {dimension_numbers = #tpu.dot_dimension_numbers<[1], [0], [0], [1], [0, 0, 1, 1], [], []>} : vector<16x512xbf16>, vector<512x128xbf16>, vector<16x128xf32> -> vector<16x128xf32>
    %64 = arith.addf %0, %63 : vector<16x128xf32>
    %c0_19 = arith.constant 0 : index
    %c0_20 = arith.constant 0 : index
    %65 = vector.load %arg5[%c0_19, %c0_20] : memref<1x128xf32, #tpu.memory_space<vmem>>, vector<1x128xf32>
    %66 = vector.broadcast %65 : vector<1x128xf32> to vector<16x128xf32>
    %67 = arith.addf %64, %66 : vector<16x128xf32>
    %cst_21 = arith.constant dense<0.000000e+00> : vector<16xf32>
    %68 = vector.multi_reduction <add>, %67, %cst_21 [1] : vector<16x128xf32> to vector<16xf32>
    %69 = vector.shape_cast %68 : vector<16xf32> to vector<16x1xf32>
    %cst_22 = arith.constant 3.125000e-02 : f32
    %70 = vector.broadcast %cst_22 : f32 to vector<16x1xf32>
    %71 = arith.mulf %69, %70 : vector<16x1xf32>
    %72 = arith.mulf %67, %67 : vector<16x128xf32>
    %cst_23 = arith.constant dense<0.000000e+00> : vector<16xf32>
    %73 = vector.multi_reduction <add>, %72, %cst_23 [1] : vector<16x128xf32> to vector<16xf32>
    %74 = vector.shape_cast %73 : vector<16xf32> to vector<16x1xf32>
    %cst_24 = arith.constant 3.125000e-02 : f32
    %75 = vector.broadcast %cst_24 : f32 to vector<16x1xf32>
    %76 = arith.mulf %74, %75 : vector<16x1xf32>
    %77 = arith.mulf %71, %71 : vector<16x1xf32>
    %78 = arith.subf %76, %77 : vector<16x1xf32>
    %79 = vector.broadcast %71 : vector<16x1xf32> to vector<16x128xf32>
    %80 = arith.subf %67, %79 : vector<16x128xf32>
    %cst_25 = arith.constant 9.99999974E-6 : f32
    %81 = vector.broadcast %cst_25 : f32 to vector<16x1xf32>
    %82 = arith.addf %78, %81 : vector<16x1xf32>
    %83 = math.rsqrt %82 : vector<16x1xf32>
    %84 = vector.broadcast %83 : vector<16x1xf32> to vector<16x128xf32>
    %85 = arith.mulf %80, %84 : vector<16x128xf32>
    %86 = arith.truncf %85 : vector<16x128xf32> to vector<16x128xbf16>
    %c0_26 = arith.constant 0 : index
    %c0_27 = arith.constant 0 : index
    %87 = vector.load %arg6[%c0_26, %c0_27] : memref<128x128xbf16, #tpu.memory_space<vmem>>, vector<128x128xbf16>
    %cst_28 = arith.constant dense<0.000000e+00> : vector<16x128xf32>
    %88 = tpu.matmul %86, %87, %cst_28 {dimension_numbers = #tpu.dot_dimension_numbers<[1], [0], [0], [1], [0, 0, 1, 1], [], []>} : vector<16x128xbf16>, vector<128x128xbf16>, vector<16x128xf32> -> vector<16x128xf32>
    %c0_29 = arith.constant 0 : index
    %c0_30 = arith.constant 0 : index
    %89 = vector.load %arg7[%c0_29, %c0_30] : memref<1x128xf32, #tpu.memory_space<vmem>>, vector<1x128xf32>
    %90 = vector.broadcast %89 : vector<1x128xf32> to vector<16x128xf32>
    %91 = arith.addf %88, %90 : vector<16x128xf32>
    %cst_31 = arith.constant 5.000000e-01 : f32
    %92 = vector.broadcast %cst_31 : f32 to vector<16x128xf32>
    %93 = arith.mulf %92, %91 : vector<16x128xf32>
    %cst_32 = arith.constant 0.707106769 : f32
    %94 = vector.broadcast %cst_32 : f32 to vector<16x128xf32>
    %95 = arith.mulf %91, %94 : vector<16x128xf32>
    %96 = math.absf %95 : vector<16x128xf32>
    %cst_33 = arith.constant 0.327591091 : f32
    %97 = vector.broadcast %cst_33 : f32 to vector<16x128xf32>
    %98 = arith.mulf %97, %96 : vector<16x128xf32>
    %cst_34 = arith.constant 1.000000e+00 : f32
    %99 = vector.broadcast %cst_34 : f32 to vector<16x128xf32>
    %100 = arith.addf %99, %98 : vector<16x128xf32>
    %cst_35 = arith.constant 1.000000e+00 : f32
    %101 = vector.broadcast %cst_35 : f32 to vector<16x128xf32>
    %102 = arith.divf %101, %100 : vector<16x128xf32>
    %cst_36 = arith.constant 1.06140542 : f32
    %103 = vector.broadcast %cst_36 : f32 to vector<16x128xf32>
    %104 = arith.mulf %103, %102 : vector<16x128xf32>
    %cst_37 = arith.constant -1.45315206 : f32
    %105 = vector.broadcast %cst_37 : f32 to vector<16x128xf32>
    %106 = arith.addf %104, %105 : vector<16x128xf32>
    %107 = arith.mulf %106, %102 : vector<16x128xf32>
    %cst_38 = arith.constant 1.42141378 : f32
    %108 = vector.broadcast %cst_38 : f32 to vector<16x128xf32>
    %109 = arith.addf %107, %108 : vector<16x128xf32>
    %110 = arith.mulf %109, %102 : vector<16x128xf32>
    %cst_39 = arith.constant -0.284496725 : f32
    %111 = vector.broadcast %cst_39 : f32 to vector<16x128xf32>
    %112 = arith.addf %110, %111 : vector<16x128xf32>
    %113 = arith.mulf %112, %102 : vector<16x128xf32>
    %cst_40 = arith.constant 0.254829586 : f32
    %114 = vector.broadcast %cst_40 : f32 to vector<16x128xf32>
    %115 = arith.addf %113, %114 : vector<16x128xf32>
    %116 = arith.mulf %115, %102 : vector<16x128xf32>
    %cst_41 = arith.constant 0.000000e+00 : f32
    %117 = vector.broadcast %cst_41 : f32 to vector<16x128xf32>
    %118 = arith.subf %117, %96 : vector<16x128xf32>
    %119 = arith.mulf %118, %96 : vector<16x128xf32>
    %120 = math.exp %119 : vector<16x128xf32>
    %121 = arith.mulf %116, %120 : vector<16x128xf32>
    %cst_42 = arith.constant 1.000000e+00 : f32
    %122 = vector.broadcast %cst_42 : f32 to vector<16x128xf32>
    %123 = arith.subf %122, %121 : vector<16x128xf32>
    %cst_43 = arith.constant 0.000000e+00 : f32
    %124 = vector.broadcast %cst_43 : f32 to vector<16x128xf32>
    %125 = arith.cmpf oge, %95, %124 : vector<16x128xf32>
    %cst_44 = arith.constant 0.000000e+00 : f32
    %126 = vector.broadcast %cst_44 : f32 to vector<16x128xf32>
    %127 = arith.subf %126, %123 : vector<16x128xf32>
    %128 = arith.select %125, %123, %127 : vector<16x128xi1>, vector<16x128xf32>
    %cst_45 = arith.constant 1.000000e+00 : f32
    %129 = vector.broadcast %cst_45 : f32 to vector<16x128xf32>
    %130 = arith.addf %129, %128 : vector<16x128xf32>
    %131 = arith.mulf %93, %130 : vector<16x128xf32>
    %132 = arith.truncf %131 : vector<16x128xf32> to vector<16x128xbf16>
    %c0_46 = arith.constant 0 : index
    %c0_47 = arith.constant 0 : index
    %133 = vector.load %arg8[%c0_46, %c0_47] : memref<128x128xbf16, #tpu.memory_space<vmem>>, vector<128x128xbf16>
    %cst_48 = arith.constant dense<0.000000e+00> : vector<16x128xf32>
    %134 = tpu.matmul %132, %133, %cst_48 {dimension_numbers = #tpu.dot_dimension_numbers<[1], [0], [0], [1], [0, 0, 1, 1], [], []>} : vector<16x128xbf16>, vector<128x128xbf16>, vector<16x128xf32> -> vector<16x128xf32>
    %c0_49 = arith.constant 0 : index
    %c0_50 = arith.constant 0 : index
    %135 = vector.load %arg9[%c0_49, %c0_50] : memref<1x128xf32, #tpu.memory_space<vmem>>, vector<1x128xf32>
    %136 = vector.broadcast %135 : vector<1x128xf32> to vector<16x128xf32>
    %137 = arith.addf %134, %136 : vector<16x128xf32>
    %138 = arith.addf %67, %137 : vector<16x128xf32>
    %c0_51 = arith.constant 0 : index
    %c0_52 = arith.constant 0 : index
    %139 = vector.load %arg10[%c0_51, %c0_52] : memref<16x128xf32, #tpu.memory_space<vmem>>, vector<16x128xf32>
    tpu.vector_store %arg10[%c0_51, %c0_52], %138 {strides = array<i32>} : memref<16x128xf32, #tpu.memory_space<vmem>>, vector<16x128xf32>,
    return
  }
}

</mosaic_0001>

<bundles_post_ra>
// kernel: tpu_custom_call.1
= control target key start
LH: loop header
LB: loop body
LE: loop exit
PB: predicated region body
PF: predicated region fallthrough
CT: control target
= control target key end

     0   :  { %15 = vsyncpa [#allocation3], 0  ;;  %s3096_s0 = inlined_call_operand.hbm [shape: f32[16,128], index: 0, kind: input, shape index: {}]   ;;  %s3097_s1 = inlined_call_operand.hbm [shape: f32[64,64], index: 1, kind: input, shape index: {}]   ;;  %s3098_s2 = inlined_call_operand.hbm [shape: bf16[128,1536], index: 2, kind: input, shape index: {}]   ;;  %s3099_s3 = inlined_call_operand.hbm [shape: f32[1,1536], index: 3, kind: input, shape index: {}]   ;;  %s3100_s4 = inlined_call_operand.hbm [shape: bf16[512,128], index: 4, kind: input, shape index: {}]   ;;  %s3101_s5 = inlined_call_operand.vmem [shape: f32[1,128], index: 5, kind: input, shape index: {}]   ;;  %s3102_s6 = inlined_call_operand.hbm [shape: bf16[128,128], index: 6, kind: input, shape index: {}]   ;;  %s3103_s7 = inlined_call_operand.vmem [shape: f32[1,128], index: 7, kind: input, shape index: {}]   ;;  %s3104_s8 = inlined_call_operand.hbm [shape: bf16[128,128], index: 8, kind: input, shape index: {}]   ;;  %s3105_s9 = inlined_call_operand.vmem [shape: f32[1,128], index: 9, kind: input, shape index: {}]   ;;  %s3106_s10 = inlined_call_operand.hbm [shape: f32[16,128], index: 10, kind: output, shape index: {}]  }
   0x1   :  { %16 = vsyncpa [#allocation6], 0 }
   0x2   :  { %17 = vsyncpa [#allocation9], 0 }
   0x3   :  { %18 = vsyncpa [#allocation12], 0 }
   0x4   :  { %19 = vsyncpa [#allocation4], 0  ;;  %s37_s15 = sshll.u32 %s3097_s1, 4  ;;  %s2867_s16 = smov [#allocation5]   ;;  %s38_s15 = int_to_ptr.hbm [resolvable:$true] %s37_s15 }
   0x5   :  { %s39_s17 = sshll.u32 %s2867_s16, 4  ;;  %s64_s20 = sshll.u32 %s3099_s3, 4  ;;  %s40_s17 = int_to_ptr.vmem [resolvable:$true] %s39_s17  ;;  %s65_s20 = int_to_ptr.hbm [resolvable:$true] %s64_s20 }
   0x6   :  { %s2868_s21 = smov 128   ;;  %s2869_s22 = smov 8  }
   0x7   :  { %45 = dma.hbm_to_vmem [thread:$0]  %s38_s15, 1024, %s40_s17, [#allocation6], %s2868_s21, %s2868_s21, %s2869_s22  }
   0x8   :  { %s2870_s23 = smov [#allocation8]   ;;  %s89_s26 = sshll.u32 %s3102_s6, 4  ;;  %s90_s26 = int_to_ptr.hbm [resolvable:$true] %s89_s26 }
   0x9   :  { %s66_s24 = sshll.u32 %s2870_s23, 4  ;;  %s2871_s27 = smov [#allocation11]   ;;  %s67_s24 = int_to_ptr.vmem [resolvable:$true] %s66_s24 }
   0xa   :  { %69 = dma.hbm_to_vmem [thread:$0]  %s65_s20, 192, %s67_s24, [#allocation9]  }
   0xb   :  { %s91_s28 = sshll.u32 %s2871_s27, 4  ;;  %s24_s30 = sshll.u32 %s3096_s0, 4  ;;  %s92_s28 = int_to_ptr.vmem [resolvable:$true] %s91_s28  ;;  %s25_s30 = int_to_ptr.hbm [resolvable:$true] %s24_s30 }
   0xc   :  { %s2872_s11 = smov 64   ;;  %s2873_s12 = smov 4  }
   0xd   :  { %97 = dma.hbm_to_vmem [thread:$0]  %s90_s26, 1024, %s92_s28, [#allocation12], %s2872_s11, %s2872_s11, %s2873_s12  }
   0xe   :  { %s2874_s13 = smov [#allocation2]   ;;  %s50_s6 = sshll.u32 %s3098_s2, 4  ;;  %s51_s6 = int_to_ptr.hbm [resolvable:$true] %s50_s6 }
   0xf   :  { %s26_s14 = sshll.u32 %s2874_s13, 4  ;;  %s2875_s0 = smov [#allocation7]   ;;  %s27_s14 = int_to_ptr.vmem [resolvable:$true] %s26_s14 }
  0x10   :  { %32 = dma.hbm_to_vmem [thread:$0]  %s25_s30, 256, %s27_s14, [#allocation3], %s2868_s21, %s2868_s21, %s2869_s22  }
  0x11   :  { %s52_s17 = sshll.u32 %s2875_s0, 4  ;;  %s74_s20 = sshll.u32 %s3100_s4, 4  ;;  %s53_s17 = int_to_ptr.vmem [resolvable:$true] %s52_s17  ;;  %s75_s20 = int_to_ptr.hbm [resolvable:$true] %s74_s20 }
  0x12   :  { %s2876_s23 = smov 768   ;;  %s2877_s24 = smov 48  }
  0x13   :  { %58 = dma.hbm_to_vmem [thread:$0]  %s51_s6, 12288, %s53_s17, [#allocation6], %s2876_s23, %s2876_s23, %s2877_s24  }
  0x14   :  { %s2878_s1 = smov [#allocation10]   ;;  %s104_s27 = sshll.u32 %s3104_s8, 4  ;;  %s105_s27 = int_to_ptr.hbm [resolvable:$true] %s104_s27 }
  0x15   :  { %s76_s25 = sshll.u32 %s2878_s1, 4  ;;  %s2879_s28 = smov [#allocation13]   ;;  %s77_s25 = int_to_ptr.vmem [resolvable:$true] %s76_s25 }
  0x16   :  { %82 = dma.hbm_to_vmem [thread:$0]  %s75_s20, 4096, %s77_s25, [#allocation9], %s2872_s11, %s2872_s11, %s2873_s12  }
  0x17   :  { %s106_s3 = sshll.u32 %s2879_s28, 4  ;;  %s107_s3 = int_to_ptr.vmem [resolvable:$true] %s106_s3 }
  0x18   :  { %112 = dma.hbm_to_vmem [thread:$0]  %s105_s27, 1024, %s107_s3, [#allocation12], %s2872_s11, %s2872_s11, %s2873_s12  }
  0x19   :  { %2857 = dma.done.wait [#allocation3], 256  }
  0x1a   :  { %2858 = vsyncadd [#allocation3], 4294967040 }
  0x1b   :  { %2859 = dma.done.wait [#allocation6], 13312  }
  0x1c   :  { %2860 = vsyncadd [#allocation6], 4294953984 }
  0x1d   :  { %2861 = dma.done.wait [#allocation9], 4288  }
  0x1e   :  { %2862 = vsyncadd [#allocation9], 4294963008 }
  0x1f   :  { %2863 = dma.done.wait [#allocation12], 2048  }
  0x20   :  { %2864 = vsyncadd [#allocation12], 4294965248  ;;  %v2972_v0 = vld [vmem:[#allocation2] sm:$0xff]  ;;  %v2212_v1 = vld [vmem:[#allocation7 + $0x2a0] sm:$0xf]  ;;  %vm1072_vm6 = vcmask 523264  }
  0x21   :  { %146 = vadd.xlane.f32.xlu0 %v2972_v0  ;;  %v152_v2 = vmul.f32 %v2972_v0, %v2972_v0  ;;  %v2544_v3 = vld [vmem:[#allocation7 + $0x2cc] sm:$0xf0]  ;;  %v2538_v4 = vld [vmem:[#allocation7 + $0x2a4] sm:$0xf]  ;;  %v2214_v5 = vld [vmem:[#allocation7 + $0x2d0] sm:$0xf0] }
  0x22   :  { %v2977_v6 = vld [vmem:[#allocation2 + $0x8] sm:$0xff]  ;;  %v2213_v7 = vor.u32 %v2544_v3, %v2212_v1  ;;  %v2217_v8 = vor.u32 %v2538_v4, %v2214_v5  ;;  %v2220_v9 = vld [vmem:[#allocation7 + $0x2a8] sm:$0xf]  ;;  %v2539_v11 = vld [vmem:[#allocation7 + $0x2ac] sm:$0xf]  ;;  %s2880_s11 = smov [#allocation14]  }
  0x23   :  { %v2545_v10 = vld [vmem:[#allocation7 + $0x2d4] sm:$0xf0]  ;;  %154 = vadd.xlane.f32.xlu1 %v152_v2  ;;  %v2222_v13 = vld [vmem:[#allocation7 + $0x2d8] sm:$0xf0]  ;;  %v2164_v14 = vld [vmem:[#allocation7 + $0x240] sm:$0xf]  ;;  %v153_v30 = vmul.f32 %v2977_v6, %v2977_v6 }
  0x24   :  { %v2221_v12 = vor.u32 %v2545_v10, %v2220_v9  ;;  %v2532_v15 = vld [vmem:[#allocation7 + $0x26c] sm:$0xf0]  ;;  %795 = vmatpush.bf16.msra.mxu0 %v2213_v7  ;;  %809 = vmatpush.bf16.msra.mxu1 %v2217_v8  ;;  %v2225_v16 = vor.u32 %v2539_v11, %v2222_v13  ;;  %v2526_v18 = vld [vmem:[#allocation7 + $0x244] sm:$0xf]  ;;  %v2166_v19 = vld [vmem:[#allocation7 + $0x270] sm:$0xf0] }
  0x25   :  { %v2165_v17 = vor.u32 %v2532_v15, %v2164_v14  ;;  %v2172_v20 = vld [vmem:[#allocation7 + $0x248] sm:$0xf]  ;;  %v2169_v21 = vor.u32 %v2526_v18, %v2166_v19  ;;  %v2533_v22 = vld [vmem:[#allocation7 + $0x274] sm:$0xf0]  ;;  %v2527_v23 = vld [vmem:[#allocation7 + $0x24c] sm:$0xf] }
  0x26   :  { %823 = vmatpush.bf16.msra.mxu2 %v2221_v12  ;;  %v2174_v24 = vld [vmem:[#allocation7 + $0x278] sm:$0xf0]  ;;  %837 = vmatpush.bf16.msra.mxu3 %v2225_v16  ;;  %v2173_v25 = vor.u32 %v2533_v22, %v2172_v20  ;;  %v2116_v27 = vld [vmem:[#allocation7 + $0x1e0] sm:$0xf]  ;;  %v2520_v28 = vld [vmem:[#allocation7 + $0x20c] sm:$0xf0] }
  0x27   :  { %v2177_v26 = vor.u32 %v2527_v23, %v2174_v24  ;;  %v2514_v29 = vld [vmem:[#allocation7 + $0x1e4] sm:$0xf]  ;;  %v2118_v31 = vld [vmem:[#allocation7 + $0x210] sm:$0xf0]  ;;  %v2124_v32 = vld [vmem:[#allocation7 + $0x1e8] sm:$0xf]  ;;  %v2117_v34 = vor.u32 %v2520_v28, %v2116_v27 }
  0x28   :  { %v2521_v33 = vld [vmem:[#allocation7 + $0x214] sm:$0xf0]  ;;  %796 = vmatpush.bf16.msra.mxu0 %v2165_v17  ;;  %810 = vmatpush.bf16.msra.mxu1 %v2169_v21  ;;  %v2121_v35 = vor.u32 %v2514_v29, %v2118_v31  ;;  %v2515_v36 = vld [vmem:[#allocation7 + $0x1ec] sm:$0xf]  ;;  %v2126_v37 = vld [vmem:[#allocation7 + $0x218] sm:$0xf0] }
  0x29   :  { %v2068_v38 = vld [vmem:[#allocation7 + $0x180] sm:$0xf]  ;;  %148 = vadd.xlane.f32.xlu0 %v2977_v6  ;;  %v2125_v39 = vor.u32 %v2521_v33, %v2124_v32  ;;  %v2508_v40 = vld [vmem:[#allocation7 + $0x1ac] sm:$0xf0]  ;;  %v2502_v41 = vld [vmem:[#allocation7 + $0x184] sm:$0xf]  ;;  %v2129_v43 = vor.u32 %v2515_v36, %v2126_v37 }
  0x2a   :  { %824 = vmatpush.bf16.msra.mxu2 %v2173_v25  ;;  %v2070_v42 = vld [vmem:[#allocation7 + $0x1b0] sm:$0xf0]  ;;  %838 = vmatpush.bf16.msra.mxu3 %v2177_v26  ;;  %v2076_v44 = vld [vmem:[#allocation7 + $0x188] sm:$0xf]  ;;  %v2509_v45 = vld [vmem:[#allocation7 + $0x1b4] sm:$0xf0]  ;;  %v2069_v48 = vor.u32 %v2508_v40, %v2068_v38 }
  0x2b   :  { %156 = vadd.xlane.f32.xlu1 %v153_v30  ;;  %v2503_v46 = vld [vmem:[#allocation7 + $0x18c] sm:$0xf]  ;;  %v2078_v47 = vld [vmem:[#allocation7 + $0x1b8] sm:$0xf0]  ;;  %v2073_v49 = vor.u32 %v2502_v41, %v2070_v42  ;;  %v2020_v50 = vld [vmem:[#allocation7 + $0x120] sm:$0xf]  ;;  %v2077_v53 = vor.u32 %v2509_v45, %v2076_v44 }
  0x2c   :  { %797 = vmatpush.bf16.msra.mxu0 %v2117_v34  ;;  %811 = vmatpush.bf16.msra.mxu1 %v2121_v35  ;;  %v2496_v51 = vld [vmem:[#allocation7 + $0x14c] sm:$0xf0]  ;;  %v2490_v52 = vld [vmem:[#allocation7 + $0x124] sm:$0xf]  ;;  %v2022_v54 = vld [vmem:[#allocation7 + $0x150] sm:$0xf0]  ;;  %v2081_v57 = vor.u32 %v2503_v46, %v2078_v47 }
  0x2d   :  { %v2028_v55 = vld [vmem:[#allocation7 + $0x128] sm:$0xf]  ;;  %v2497_v56 = vld [vmem:[#allocation7 + $0x154] sm:$0xf0]  ;;  %v2491_v58 = vld [vmem:[#allocation7 + $0x12c] sm:$0xf]  ;;  %v2021_v60 = vor.u32 %v2496_v51, %v2020_v50  ;;  %v2025_v61 = vor.u32 %v2490_v52, %v2022_v54 }
  0x2e   :  { %825 = vmatpush.bf16.msra.mxu2 %v2125_v39  ;;  %839 = vmatpush.bf16.msra.mxu3 %v2129_v43  ;;  %v2030_v59 = vld [vmem:[#allocation7 + $0x158] sm:$0xf0]  ;;  %v2029_v62 = vor.u32 %v2497_v56, %v2028_v55  ;;  %v1972_v1 = vld [vmem:[#allocation7 + $0xc0] sm:$0xf]  ;;  %v2484_v2 = vld [vmem:[#allocation7 + $0xec] sm:$0xf0] }
  0x2f   :  { %v2033_v63 = vor.u32 %v2491_v58, %v2030_v59  ;;  %v2478_v3 = vld [vmem:[#allocation7 + $0xc4] sm:$0xf]  ;;  %v1973_v4 = vor.u32 %v2484_v2, %v1972_v1  ;;  %v1974_v5 = vld [vmem:[#allocation7 + $0xf0] sm:$0xf0]  ;;  %v1980_v7 = vld [vmem:[#allocation7 + $0xc8] sm:$0xf] }
  0x30   :  { %798 = vmatpush.bf16.msra.mxu0 %v2069_v48  ;;  %812 = vmatpush.bf16.msra.mxu1 %v2073_v49  ;;  %v2485_v8 = vld [vmem:[#allocation7 + $0xf4] sm:$0xf0]  ;;  %v1977_v9 = vor.u32 %v2478_v3, %v1974_v5  ;;  %v2479_v11 = vld [vmem:[#allocation7 + $0xcc] sm:$0xf]  ;;  %v1982_v12 = vld [vmem:[#allocation7 + $0xf8] sm:$0xf0] }
  0x31   :  { %v1981_v10 = vor.u32 %v2485_v8, %v1980_v7  ;;  %v1985_v13 = vor.u32 %v2479_v11, %v1982_v12  ;;  %v1924_v14 = vld [vmem:[#allocation7 + $0x60] sm:$0xf]  ;;  %v2472_v15 = vld [vmem:[#allocation7 + $0x8c] sm:$0xf0]  ;;  %v2466_v16 = vld [vmem:[#allocation7 + $0x64] sm:$0xf] }
  0x32   :  { %826 = vmatpush.bf16.msra.mxu2 %v2077_v53  ;;  %840 = vmatpush.bf16.msra.mxu3 %v2081_v57  ;;  %v1925_v17 = vor.u32 %v2472_v15, %v1924_v14  ;;  %v1926_v18 = vld [vmem:[#allocation7 + $0x90] sm:$0xf0]  ;;  %v1932_v19 = vld [vmem:[#allocation7 + $0x68] sm:$0xf]  ;;  %v2473_v20 = vld [vmem:[#allocation7 + $0x94] sm:$0xf0] }
  0x33   :  { %v1929_v21 = vor.u32 %v2466_v16, %v1926_v18  ;;  %v1933_v22 = vor.u32 %v2473_v20, %v1932_v19  ;;  %v2467_v23 = vld [vmem:[#allocation7 + $0x6c] sm:$0xf]  ;;  %v1934_v24 = vld [vmem:[#allocation7 + $0x98] sm:$0xf0]  ;;  %v1876_v26 = vld [vmem:[#allocation7] sm:$0xf] }
  0x34   :  { %799 = vmatpush.bf16.msra.mxu0 %v2021_v60  ;;  %813 = vmatpush.bf16.msra.mxu1 %v2025_v61  ;;  %v1937_v25 = vor.u32 %v2467_v23, %v1934_v24  ;;  %v2460_v27 = vld [vmem:[#allocation7 + $0x2c] sm:$0xf0]  ;;  %v2454_v28 = vld [vmem:[#allocation7 + $0x4] sm:$0xf]  ;;  %v1878_v30 = vld [vmem:[#allocation7 + $0x30] sm:$0xf0] }
  0x35   :  { %v1877_v29 = vor.u32 %v2460_v27, %v1876_v26  ;;  %v1884_v31 = vld [vmem:[#allocation7 + $0x8] sm:$0xf]  ;;  %v2461_v32 = vld [vmem:[#allocation7 + $0x34] sm:$0xf0]  ;;  %v1881_v33 = vor.u32 %v2454_v28, %v1878_v30  ;;  %v2455_v35 = vld [vmem:[#allocation7 + $0xc] sm:$0xf] }
  0x36   :  { %827 = vmatpush.bf16.msra.mxu2 %v2029_v62  ;;  %841 = vmatpush.bf16.msra.mxu3 %v2033_v63  ;;  %v1885_v34 = vor.u32 %v2461_v32, %v1884_v31  ;;  %v1886_v36 = vld [vmem:[#allocation7 + $0x38] sm:$0xf0]  ;;  %v2228_v37 = vld [vmem:[#allocation7 + $0x2b0] sm:$0xf]  ;;  %v2546_v39 = vld [vmem:[#allocation7 + $0x2dc] sm:$0xf0] }
  0x37   :  { %v1889_v38 = vor.u32 %v2455_v35, %v1886_v36  ;;  %v2540_v40 = vld [vmem:[#allocation7 + $0x2b4] sm:$0xf]  ;;  %v2230_v41 = vld [vmem:[#allocation7 + $0x2e0] sm:$0xf0]  ;;  %v2229_v42 = vor.u32 %v2546_v39, %v2228_v37  ;;  %v2236_v44 = vld [vmem:[#allocation7 + $0x2b8] sm:$0xf] }
  0x38   :  { %800 = vmatpush.bf16.msra.mxu0 %v1973_v4  ;;  %814 = vmatpush.bf16.msra.mxu1 %v1977_v9  ;;  %v2233_v43 = vor.u32 %v2540_v40, %v2230_v41  ;;  %v2547_v45 = vld [vmem:[#allocation7 + $0x2e4] sm:$0xf0]  ;;  %v2541_v46 = vld [vmem:[#allocation7 + $0x2bc] sm:$0xf]  ;;  %v2238_v48 = vld [vmem:[#allocation7 + $0x2e8] sm:$0xf0] }
  0x39   :  { %v2237_v47 = vor.u32 %v2547_v45, %v2236_v44  ;;  %v2180_v49 = vld [vmem:[#allocation7 + $0x250] sm:$0xf]  ;;  %v2534_v50 = vld [vmem:[#allocation7 + $0x27c] sm:$0xf0]  ;;  %v2241_v51 = vor.u32 %v2541_v46, %v2238_v48  ;;  %v2528_v53 = vld [vmem:[#allocation7 + $0x254] sm:$0xf] }
  0x3a   :  { %828 = vmatpush.bf16.msra.mxu2 %v1981_v10  ;;  %842 = vmatpush.bf16.msra.mxu3 %v1985_v13  ;;  %v2181_v52 = vor.u32 %v2534_v50, %v2180_v49  ;;  %v2182_v54 = vld [vmem:[#allocation7 + $0x280] sm:$0xf0]  ;;  %v2188_v55 = vld [vmem:[#allocation7 + $0x258] sm:$0xf]  ;;  %v2535_v57 = vld [vmem:[#allocation7 + $0x284] sm:$0xf0] }
  0x3b   :  { %v2185_v56 = vor.u32 %v2528_v53, %v2182_v54  ;;  %v2529_v58 = vld [vmem:[#allocation7 + $0x25c] sm:$0xf]  ;;  %v2190_v59 = vld [vmem:[#allocation7 + $0x288] sm:$0xf0]  ;;  %v2189_v60 = vor.u32 %v2535_v57, %v2188_v55  ;;  %v2132_v62 = vld [vmem:[#allocation7 + $0x1f0] sm:$0xf] }
  0x3c   :  { %801 = vmatpush.bf16.msra.mxu0 %v1925_v17  ;;  %815 = vmatpush.bf16.msra.mxu1 %v1929_v21  ;;  %v2193_v61 = vor.u32 %v2529_v58, %v2190_v59  ;;  %v2522_v63 = vld [vmem:[#allocation7 + $0x21c] sm:$0xf0]  ;;  %v2516_v1 = vld [vmem:[#allocation7 + $0x1f4] sm:$0xf]  ;;  %v2134_v3 = vld [vmem:[#allocation7 + $0x220] sm:$0xf0] }
  0x3d   :  { %v2133_v2 = vor.u32 %v2522_v63, %v2132_v62  ;;  %v2140_v4 = vld [vmem:[#allocation7 + $0x1f8] sm:$0xf]  ;;  %v2523_v5 = vld [vmem:[#allocation7 + $0x224] sm:$0xf0]  ;;  %v2137_v7 = vor.u32 %v2516_v1, %v2134_v3  ;;  %v2517_v9 = vld [vmem:[#allocation7 + $0x1fc] sm:$0xf] }
  0x3e   :  { %829 = vmatpush.bf16.msra.mxu2 %v1933_v22  ;;  %843 = vmatpush.bf16.msra.mxu3 %v1937_v25  ;;  %v2141_v8 = vor.u32 %v2523_v5, %v2140_v4  ;;  %v2142_v10 = vld [vmem:[#allocation7 + $0x228] sm:$0xf0]  ;;  %v2084_v12 = vld [vmem:[#allocation7 + $0x190] sm:$0xf]  ;;  %v2510_v13 = vld [vmem:[#allocation7 + $0x1bc] sm:$0xf0] }
  0x3f   :  { %v2145_v11 = vor.u32 %v2517_v9, %v2142_v10  ;;  %v2504_v14 = vld [vmem:[#allocation7 + $0x194] sm:$0xf]  ;;  %v2085_v15 = vor.u32 %v2510_v13, %v2084_v12  ;;  %v2086_v16 = vld [vmem:[#allocation7 + $0x1c0] sm:$0xf0]  ;;  %v2092_v17 = vld [vmem:[#allocation7 + $0x198] sm:$0xf] }
  0x40   :  { %802 = vmatpush.bf16.msra.mxu0 %v1877_v29  ;;  %816 = vmatpush.bf16.msra.mxu1 %v1881_v33  ;;  %v2511_v18 = vld [vmem:[#allocation7 + $0x1c4] sm:$0xf0]  ;;  %v2089_v19 = vor.u32 %v2504_v14, %v2086_v16  ;;  %v2505_v21 = vld [vmem:[#allocation7 + $0x19c] sm:$0xf]  ;;  %v2094_v22 = vld [vmem:[#allocation7 + $0x1c8] sm:$0xf0] }
  0x41   :  { %v2093_v20 = vor.u32 %v2511_v18, %v2092_v17  ;;  %v2097_v23 = vor.u32 %v2505_v21, %v2094_v22  ;;  %v2036_v24 = vld [vmem:[#allocation7 + $0x130] sm:$0xf]  ;;  %v2498_v25 = vld [vmem:[#allocation7 + $0x15c] sm:$0xf0]  ;;  %v2492_v26 = vld [vmem:[#allocation7 + $0x134] sm:$0xf] }
  0x42   :  { %830 = vmatpush.bf16.msra.mxu2 %v1885_v34  ;;  %844 = vmatpush.bf16.msra.mxu3 %v1889_v38  ;;  %v2037_v27 = vor.u32 %v2498_v25, %v2036_v24  ;;  %v2038_v28 = vld [vmem:[#allocation7 + $0x160] sm:$0xf0]  ;;  %v2044_v29 = vld [vmem:[#allocation7 + $0x138] sm:$0xf]  ;;  %v2499_v30 = vld [vmem:[#allocation7 + $0x164] sm:$0xf0] }
  0x43   :  { %v2041_v31 = vor.u32 %v2492_v26, %v2038_v28  ;;  %v2045_v32 = vor.u32 %v2499_v30, %v2044_v29  ;;  %v2493_v33 = vld [vmem:[#allocation7 + $0x13c] sm:$0xf]  ;;  %v2046_v34 = vld [vmem:[#allocation7 + $0x168] sm:$0xf0]  ;;  %v1988_v36 = vld [vmem:[#allocation7 + $0xd0] sm:$0xf] }
  0x44   :  { %851 = vmatpush.bf16.msrb.mxu0 %v2229_v42  ;;  %865 = vmatpush.bf16.msrb.mxu1 %v2233_v43  ;;  %v2049_v35 = vor.u32 %v2493_v33, %v2046_v34  ;;  %v2486_v37 = vld [vmem:[#allocation7 + $0xfc] sm:$0xf0]  ;;  %v2480_v38 = vld [vmem:[#allocation7 + $0xd4] sm:$0xf]  ;;  %v1990_v40 = vld [vmem:[#allocation7 + $0x100] sm:$0xf0] }
  0x45   :  { %v1989_v39 = vor.u32 %v2486_v37, %v1988_v36  ;;  %v1996_v41 = vld [vmem:[#allocation7 + $0xd8] sm:$0xf]  ;;  %v2487_v42 = vld [vmem:[#allocation7 + $0x104] sm:$0xf0]  ;;  %v1993_v43 = vor.u32 %v2480_v38, %v1990_v40  ;;  %v2481_v45 = vld [vmem:[#allocation7 + $0xdc] sm:$0xf] }
  0x46   :  { %879 = vmatpush.bf16.msrb.mxu2 %v2237_v47  ;;  %893 = vmatpush.bf16.msrb.mxu3 %v2241_v51  ;;  %v1997_v44 = vor.u32 %v2487_v42, %v1996_v41  ;;  %v1998_v46 = vld [vmem:[#allocation7 + $0x108] sm:$0xf0]  ;;  %v1940_v49 = vld [vmem:[#allocation7 + $0x70] sm:$0xf]  ;;  %v2474_v50 = vld [vmem:[#allocation7 + $0x9c] sm:$0xf0] }
  0x47   :  { %v2001_v47 = vor.u32 %v2481_v45, %v1998_v46  ;;  %v2468_v51 = vld [vmem:[#allocation7 + $0x74] sm:$0xf]  ;;  %v1941_v53 = vor.u32 %v2474_v50, %v1940_v49  ;;  %v1942_v54 = vld [vmem:[#allocation7 + $0xa0] sm:$0xf0]  ;;  %v1948_v55 = vld [vmem:[#allocation7 + $0x78] sm:$0xf] }
  0x48   :  { %852 = vmatpush.bf16.msrb.mxu0 %v2181_v52  ;;  %866 = vmatpush.bf16.msrb.mxu1 %v2185_v56  ;;  %v1945_v57 = vor.u32 %v2468_v51, %v1942_v54  ;;  %v2475_v58 = vld [vmem:[#allocation7 + $0xa4] sm:$0xf0]  ;;  %v2469_v59 = vld [vmem:[#allocation7 + $0x7c] sm:$0xf]  ;;  %v1892_v3 = vld [vmem:[#allocation7 + $0x10] sm:$0xf] }
  0x49   :  { %v1949_v63 = vor.u32 %v2475_v58, %v1948_v55  ;;  %v2462_v4 = vld [vmem:[#allocation7 + $0x3c] sm:$0xf0]  ;;  %v2456_v5 = vld [vmem:[#allocation7 + $0x14] sm:$0xf]  ;;  %v1900_v9 = vld [vmem:[#allocation7 + $0x18] sm:$0xf] }
  0x4a   :  { %880 = vmatpush.bf16.msrb.mxu2 %v2189_v60  ;;  %894 = vmatpush.bf16.msrb.mxu3 %v2193_v61  ;;  %v1950_v60 = vld [vmem:[#allocation7 + $0xa8] sm:$0xf0]  ;;  %v2463_v10 = vld [vmem:[#allocation7 + $0x44] sm:$0xf0]  ;;  %v2457_v14 = vld [vmem:[#allocation7 + $0x1c] sm:$0xf] }
  0x4b   :  { %v1953_v1 = vor.u32 %v2469_v59, %v1950_v60  ;;  %v1901_v13 = vor.u32 %v2463_v10, %v1900_v9  ;;  %v2548_v40 = vld [vmem:[#allocation7 + $0x2ec] sm:$0xf0]  ;;  %v2542_v42 = vld [vmem:[#allocation7 + $0x2c4] sm:$0xf]  ;;  %v2254_v49 = vld [vmem:[#allocation7 + $0x2f8] sm:$0xf0] }
  0x4c   :  { %853 = vmatpush.bf16.msrb.mxu0 %v2133_v2  ;;  %867 = vmatpush.bf16.msrb.mxu1 %v2137_v7  ;;  %v1893_v7 = vor.u32 %v2462_v4, %v1892_v3  ;;  %v2196_v54 = vld [vmem:[#allocation7 + $0x260] sm:$0xf]  ;;  %v2530_v55 = vld [vmem:[#allocation7 + $0x264] sm:$0xf]  ;;  %v2537_v58 = vld [vmem:[#allocation7 + $0x294] sm:$0xf0] }
  0x4d   :  { %v2531_v59 = vld [vmem:[#allocation7 + $0x26c] sm:$0xf]  ;;  %v2206_v60 = vld [vmem:[#allocation7 + $0x298] sm:$0xf0]  ;;  %v2518_v4 = vld [vmem:[#allocation7 + $0x204] sm:$0xf] }
  0x4e   :  { %881 = vmatpush.bf16.msrb.mxu2 %v2141_v8  ;;  %895 = vmatpush.bf16.msrb.mxu3 %v2145_v11  ;;  %v1894_v8 = vld [vmem:[#allocation7 + $0x40] sm:$0xf0]  ;;  %v2209_v3 = vor.u32 %v2531_v59, %v2206_v60  ;;  %v2519_v9 = vld [vmem:[#allocation7 + $0x20c] sm:$0xf]  ;;  %v2158_v10 = vld [vmem:[#allocation7 + $0x238] sm:$0xf0] }
  0x4f   :  { %v1897_v12 = vor.u32 %v2456_v5, %v1894_v8  ;;  %v2150_v5 = vld [vmem:[#allocation7 + $0x230] sm:$0xf0]  ;;  %v2525_v8 = vld [vmem:[#allocation7 + $0x234] sm:$0xf0]  ;;  %v1908_v60 = vld [vmem:[#allocation7 + $0x20] sm:$0xf] }
  0x50   :  { %854 = vmatpush.bf16.msrb.mxu0 %v2085_v15  ;;  %868 = vmatpush.bf16.msrb.mxu1 %v2089_v19  ;;  %v1902_v15 = vld [vmem:[#allocation7 + $0x48] sm:$0xf0]  ;;  %s1856_s12 = sshll.u32 %s2880_s11, 4  ;;  %s1858_s15 = sshll.u32 %s3106_s10, 4  ;;  %s1857_s12 = int_to_ptr.vmem [resolvable:$true] %s1856_s12  ;;  %s1859_s15 = int_to_ptr.hbm [resolvable:$true] %s1858_s15 }
  0x51   :  { %v1905_v17 = vor.u32 %v2457_v14, %v1902_v15  ;;  %v2512_v14 = vld [vmem:[#allocation7 + $0x1cc] sm:$0xf0] }
  0x52   :  { %882 = vmatpush.bf16.msrb.mxu2 %v2093_v20  ;;  %896 = vmatpush.bf16.msrb.mxu3 %v2097_v23 }
  0x54   :  { %855 = vmatpush.bf16.msrb.mxu0 %v2037_v27  ;;  %869 = vmatpush.bf16.msrb.mxu1 %v2041_v31 }
  0x56   :  { %883 = vmatpush.bf16.msrb.mxu2 %v2045_v32  ;;  %897 = vmatpush.bf16.msrb.mxu3 %v2049_v35 }
  0x58   :  { %856 = vmatpush.bf16.msrb.mxu0 %v1989_v39  ;;  %870 = vmatpush.bf16.msrb.mxu1 %v1993_v43  ;;  %v2244_v39 = vld [vmem:[#allocation7 + $0x2c0] sm:$0xf]  ;;  %v2246_v43 = vld [vmem:[#allocation7 + $0x2f0] sm:$0xf0] }
  0x59   :  { %v2245_v51 = vor.u32 %v2548_v40, %v2244_v39 }
  0x5a   :  { %884 = vmatpush.bf16.msrb.mxu2 %v1997_v44  ;;  %898 = vmatpush.bf16.msrb.mxu3 %v2001_v47  ;;  %v2252_v44 = vld [vmem:[#allocation7 + $0x2c8] sm:$0xf]  ;;  %v2549_v47 = vld [vmem:[#allocation7 + $0x2f4] sm:$0xf0] }
  0x5c   :  { %857 = vmatpush.bf16.msrb.mxu0 %v1941_v53  ;;  %871 = vmatpush.bf16.msrb.mxu1 %v1945_v57  ;;  %v2249_v53 = vor.u32 %v2542_v42, %v2246_v43  ;;  %v2204_v57 = vld [vmem:[#allocation7 + $0x268] sm:$0xf]  ;;  %v2006_v42 = vld [vmem:[#allocation7 + $0x110] sm:$0xf0] }
  0x5d   :  { %v2012_v43 = vld [vmem:[#allocation7 + $0xe8] sm:$0xf] }
  0x5e   :  { %885 = vmatpush.bf16.msrb.mxu2 %v1949_v63  ;;  %899 = vmatpush.bf16.msrb.mxu3 %v1953_v1  ;;  %v2148_v63 = vld [vmem:[#allocation7 + $0x200] sm:$0xf]  ;;  %v2524_v1 = vld [vmem:[#allocation7 + $0x22c] sm:$0xf0] }
  0x60   :  { %858 = vmatpush.bf16.msrb.mxu0 %v1893_v7  ;;  %872 = vmatpush.bf16.msrb.mxu1 %v1897_v12  ;;  %v2156_v7 = vld [vmem:[#allocation7 + $0x208] sm:$0xf]  ;;  %v2153_v12 = vor.u32 %v2518_v4, %v2150_v5  ;;  %v2465_v4 = vld [vmem:[#allocation7 + $0x54] sm:$0xf0]  ;;  %v2459_v5 = vld [vmem:[#allocation7 + $0x2c] sm:$0xf] }
  0x61   :  { %v2157_v15 = vor.u32 %v2525_v8, %v2156_v7  ;;  %v1918_v7 = vld [vmem:[#allocation7 + $0x58] sm:$0xf0] }
  0x62   :  { %886 = vmatpush.bf16.msrb.mxu2 %v1901_v13  ;;  %900 = vmatpush.bf16.msrb.mxu3 %v1905_v17  ;;  %v2100_v13 = vld [vmem:[#allocation7 + $0x1a0] sm:$0xf]  ;;  %v2506_v17 = vld [vmem:[#allocation7 + $0x1a4] sm:$0xf] }
  0x94   :  { %v147_v48 = vpop.xlane.xlu0 %146 }
  0x95   :  { %v2982_v52 = vmul.f32 0.03125, %v147_v48  ;;  %v2543_v48 = vld [vmem:[#allocation7 + $0x2cc] sm:$0xf] }
  0x96   :  { %v155_v56 = vpop.xlane.xlu1 %154 }
  0x97   :  { %v160_v61 = vmul.f32 %v2982_v52, %v2982_v52  ;;  %v158_v62 = vmul.f32 0.03125, %v155_v56  ;;  %v164_v37 = vsub.f32 %v2972_v0, %v2982_v52  ;;  %v2536_v0 = vld [vmem:[#allocation7 + $0x28c] sm:$0xf0]  ;;  %v2253_v52 = vor.u32 %v2549_v47, %v2252_v44  ;;  %v2198_v56 = vld [vmem:[#allocation7 + $0x290] sm:$0xf0] }
  0x98   :  { %v2489_v44 = vld [vmem:[#allocation7 + $0x114] sm:$0xf0] }
  0x99   :  { %v162_v2 = vsub.f32 %v158_v62, %v160_v61  ;;  %v2197_v61 = vor.u32 %v2536_v0, %v2196_v54  ;;  %v2201_v62 = vor.u32 %v2530_v55, %v2198_v56  ;;  %v2470_v0 = vld [vmem:[#allocation7 + $0x84] sm:$0xf]  ;;  %v2477_v55 = vld [vmem:[#allocation7 + $0xb4] sm:$0xf0]  ;;  %v2471_v56 = vld [vmem:[#allocation7 + $0x8c] sm:$0xf] }
  0x9b   :  { %v166_v11 = vadd.f32 1e-05, %v162_v2  ;;  %v2205_v2 = vor.u32 %v2537_v58, %v2204_v57  ;;  %v1966_v57 = vld [vmem:[#allocation7 + $0xb8] sm:$0xf0] }
  0x9c   :  { %v149_v16 = vpop.xlane.xlu0 %148 }
  0x9d   :  { %2615 = vrsqrt.f32 %v166_v11  ;;  %v151_v18 = vmul.f32 0.03125, %v149_v16  ;;  %vm174_vm1 = vweird.f32 %v166_v11  ;;  %v2161_v16 = vor.u32 %v2519_v9, %v2158_v10 }
  0x9e   :  { %v157_v19 = vpop.xlane.xlu1 %156 }
  0x9f   :  { %v161_v20 = vmul.f32 %v151_v18, %v151_v18  ;;  %v159_v21 = vmul.f32 0.03125, %v157_v19  ;;  %v165_v38 = vsub.f32 %v2977_v6, %v151_v18  ;;  %v2257_v6 = vor.u32 %v2543_v48, %v2254_v49  ;;  %v2102_v18 = vld [vmem:[#allocation7 + $0x1d0] sm:$0xf0]  ;;  %v2108_v19 = vld [vmem:[#allocation7 + $0x1a8] sm:$0xf] }
  0xa0   :  { %v1956_v49 = vld [vmem:[#allocation7 + $0x80] sm:$0xf] }
  0xa1   :  { %v163_v22 = vsub.f32 %v159_v21, %v161_v20  ;;  %v2513_v20 = vld [vmem:[#allocation7 + $0x1d4] sm:$0xf0]  ;;  %v2507_v21 = vld [vmem:[#allocation7 + $0x1ac] sm:$0xf] }
  0xa3   :  { %v2616_v23 = vpop.eup %2615  ;;  %v167_v24 = vadd.f32 1e-05, %v163_v22  ;;  %v2110_v22 = vld [vmem:[#allocation7 + $0x1d8] sm:$0xf0] }
  0xa4   :  { %v169_v25 = vmul.f32 %v2616_v23, %v166_v11  ;;  %vm175_vm0 = vweird.f32 %v2616_v23  ;;  %v2149_v11 = vor.u32 %v2524_v1, %v2148_v63  ;;  %v1969_v63 = vor.u32 %v2471_v56, %v1966_v57  ;;  %v2458_v1 = vld [vmem:[#allocation7 + $0x24] sm:$0xf]  ;;  %v288_v56 = vld [vmem:[#allocation8 + $0x8] sm:$0xf] }
  0xa5   :  { %2617 = vrsqrt.f32 %v167_v24  ;;  %vm176_vm3 = vmor %vm174_vm1, %vm175_vm0  ;;  %vm184_vm4 = vweird.f32 %v167_v24 }
  0xa6   :  { %v170_v26 = vmul.f32 %v2616_v23, %v169_v25  ;;  %v2052_v25 = vld [vmem:[#allocation7 + $0x140] sm:$0xf] }
  0xa8   :  { %v171_v27 = vmul.f32 0.5, %v170_v26  ;;  %v2500_v26 = vld [vmem:[#allocation7 + $0x16c] sm:$0xf0] }
  0xaa   :  { %v172_v29 = vsub.f32 1.5, %v171_v27  ;;  %v2109_v27 = vor.u32 %v2513_v20, %v2108_v19 }
  0xab   :  { %v2618_v28 = vpop.eup %2617 }
  0xac   :  { %v179_v30 = vmul.f32 %v2618_v28, %v167_v24  ;;  %v173_v32 = vmul.f32 %v2616_v23, %v172_v29  ;;  %vm185_vm2 = vweird.f32 %v2618_v28  ;;  %v2105_v24 = vor.u32 %v2506_v17, %v2102_v18  ;;  %v2494_v29 = vld [vmem:[#allocation7 + $0x144] sm:$0xf] }
  0xad   :  { %vm186_vm5 = vmor %vm184_vm4, %vm185_vm2 }
  0xae   :  { %v180_v31 = vmul.f32 %v2618_v28, %v179_v30  ;;  %v177_v35 = vsel %vm176_vm3, %v2616_v23, %v173_v32  ;;  %v2101_v23 = vor.u32 %v2512_v14, %v2100_v13  ;;  %v2054_v30 = vld [vmem:[#allocation7 + $0x170] sm:$0xf0]  ;;  %v2501_v32 = vld [vmem:[#allocation7 + $0x174] sm:$0xf0]  ;;  %v3007_v14 = vld [vmem:[#allocation8] sm:$0xff] }
  0xaf   :  { %v188_v45 = vmul.f32 %v177_v35, %v164_v37  ;;  %v2053_v35 = vor.u32 %v2500_v26, %v2052_v25  ;;  %v2004_v37 = vld [vmem:[#allocation7 + $0xe0] sm:$0xf] }
  0xb0   :  { %v181_v33 = vmul.f32 0.5, %v180_v31  ;;  %v2060_v31 = vld [vmem:[#allocation7 + $0x148] sm:$0xf] }
  0xb1   :  { %v2061_v39 = vor.u32 %v2501_v32, %v2060_v31 }
  0xb2   :  { %v182_v34 = vsub.f32 1.5, %v181_v33  ;;  %v2495_v33 = vld [vmem:[#allocation7 + $0x14c] sm:$0xf] }
  0xb4   :  { %v183_v36 = vmul.f32 %v2618_v28, %v182_v34  ;;  %v2062_v34 = vld [vmem:[#allocation7 + $0x178] sm:$0xf0] }
  0xb5   :  { %v2065_v40 = vor.u32 %v2495_v33, %v2062_v34 }
  0xb6   :  { %v187_v41 = vsel %vm186_vm5, %v2618_v28, %v183_v36  ;;  %v2113_v28 = vor.u32 %v2507_v21, %v2110_v22  ;;  %v2057_v36 = vor.u32 %v2494_v29, %v2054_v30 }
  0xb7   :  { %v189_v46 = vmul.f32 %v187_v41, %v165_v38  ;;  %v2488_v38 = vld [vmem:[#allocation7 + $0x10c] sm:$0xf0]  ;;  %v2482_v41 = vld [vmem:[#allocation7 + $0xe4] sm:$0xf] }
  0xb8   :  { %v2005_v47 = vor.u32 %v2488_v38, %v2004_v37  ;;  %v2009_v48 = vor.u32 %v2482_v41, %v2006_v42  ;;  %v297_v38 = vperm.slane %v3007_v14, 6 }
  0xb9   :  { %v2989_v50 = vpack.c.bf16 %v189_v46, %v188_v45  ;;  %v2483_v45 = vld [vmem:[#allocation7 + $0xec] sm:$0xf]  ;;  %v2014_v46 = vld [vmem:[#allocation7 + $0x118] sm:$0xf0] }
  0xba   :  { %v2017_v54 = vor.u32 %v2483_v45, %v2014_v46 }
  0xbb   :  { %803 = vmatmul.bf16.vlgmr.msra.gmra.mxu0 %v2989_v50  ;;  %817 = vmatmul.bf16.vlgmr.msra.gmra.mxu1 %v2989_v50 }
  0xbc   :  { %831 = vmatmul.bf16.vlgmr.msra.gmra.mxu2 %v2989_v50  ;;  %845 = vmatmul.bf16.vlgmr.msra.gmra.mxu3 %v2989_v50 }
  0xbd   :  { %907 = vmatpush.bf16.msra.mxu0 %v2245_v51  ;;  %921 = vmatpush.bf16.msra.mxu1 %v2249_v53  ;;  %v2476_v51 = vld [vmem:[#allocation7 + $0xac] sm:$0xf0]  ;;  %v2013_v53 = vor.u32 %v2489_v44, %v2012_v43 }
  0xbe   :  { %935 = vmatpush.bf16.msra.mxu2 %v2253_v52  ;;  %949 = vmatpush.bf16.msra.mxu3 %v2257_v6  ;;  %v1958_v52 = vld [vmem:[#allocation7 + $0xb0] sm:$0xf0]  ;;  %v1964_v6 = vld [vmem:[#allocation7 + $0x88] sm:$0xf]  ;;  %v1957_v58 = vor.u32 %v2476_v51, %v1956_v49 }
  0xbf   :  { %v1961_v59 = vor.u32 %v2470_v0, %v1958_v52 }
  0xc1   :  { %908 = vmatpush.bf16.msra.mxu0 %v2197_v61  ;;  %922 = vmatpush.bf16.msra.mxu1 %v2201_v62  ;;  %v2464_v61 = vld [vmem:[#allocation7 + $0x4c] sm:$0xf0]  ;;  %v1965_v62 = vor.u32 %v2477_v55, %v1964_v6  ;;  %v295_v6 = vperm.slane %v3007_v14, 4  ;;  %v296_v55 = vperm.slane %v3007_v14, 5 }
  0xc2   :  { %936 = vmatpush.bf16.msra.mxu2 %v2205_v2  ;;  %950 = vmatpush.bf16.msra.mxu3 %v2209_v3  ;;  %v1910_v2 = vld [vmem:[#allocation7 + $0x50] sm:$0xf0]  ;;  %v1916_v3 = vld [vmem:[#allocation7 + $0x28] sm:$0xf]  ;;  %v1909_v8 = vor.u32 %v2464_v61, %v1908_v60  ;;  %v302_v60 = vperm.slane %v288_v56, 3 }
  0xc3   :  { %v1913_v9 = vor.u32 %v2458_v1, %v1910_v2  ;;  %v1917_v10 = vor.u32 %v2465_v4, %v1916_v3 }
  0xc5   :  { %909 = vmatpush.bf16.msra.mxu0 %v2149_v11  ;;  %923 = vmatpush.bf16.msra.mxu1 %v2153_v12  ;;  %v1921_v11 = vor.u32 %v2459_v5, %v1918_v7 }
  0xc6   :  { %937 = vmatpush.bf16.msra.mxu2 %v2157_v15  ;;  %951 = vmatpush.bf16.msra.mxu3 %v2161_v16  ;;  %v293_v15 = vperm.slane %v3007_v14, 2  ;;  %v294_v16 = vperm.slane %v3007_v14, 3 }
  0xc9   :  { %910 = vmatpush.bf16.msra.mxu0 %v2101_v23  ;;  %924 = vmatpush.bf16.msra.mxu1 %v2105_v24 }
  0xca   :  { %938 = vmatpush.bf16.msra.mxu2 %v2109_v27  ;;  %952 = vmatpush.bf16.msra.mxu3 %v2113_v28 }
  0xcb   :  { %859 = vmatmul.bf16.vlgmr.msrb.gmra.mxu0 %v2989_v50  ;;  %873 = vmatmul.bf16.vlgmr.msrb.gmra.mxu1 %v2989_v50 }
  0xcc   :  { %887 = vmatmul.bf16.vlgmr.msrb.gmra.mxu2 %v2989_v50  ;;  %901 = vmatmul.bf16.vlgmr.msrb.gmra.mxu3 %v2989_v50 }
  0xcd   :  { %911 = vmatpush.bf16.msra.mxu0 %v2053_v35  ;;  %925 = vmatpush.bf16.msra.mxu1 %v2057_v36 }
  0xce   :  { %939 = vmatpush.bf16.msra.mxu2 %v2061_v39  ;;  %953 = vmatpush.bf16.msra.mxu3 %v2065_v40  ;;  %v298_v39 = vperm.slane %v3007_v14, 7 }
  0xd1   :  { %912 = vmatpush.bf16.msra.mxu0 %v2005_v47  ;;  %926 = vmatpush.bf16.msra.mxu1 %v2009_v48 }
  0xd2   :  { %940 = vmatpush.bf16.msra.mxu2 %v2013_v53  ;;  %954 = vmatpush.bf16.msra.mxu3 %v2017_v54 }
  0xd5   :  { %913 = vmatpush.bf16.msra.mxu0 %v1957_v58  ;;  %927 = vmatpush.bf16.msra.mxu1 %v1961_v59  ;;  %v301_v59 = vperm.slane %v288_v56, 2 }
  0xd6   :  { %941 = vmatpush.bf16.msra.mxu2 %v1965_v62  ;;  %955 = vmatpush.bf16.msra.mxu3 %v1969_v63 }
  0xd9   :  { %914 = vmatpush.bf16.msra.mxu0 %v1909_v8  ;;  %928 = vmatpush.bf16.msra.mxu1 %v1913_v9 }
  0xda   :  { %942 = vmatpush.bf16.msra.mxu2 %v1917_v10  ;;  %956 = vmatpush.bf16.msra.mxu3 %v1921_v11 }
  0xdc   :  { %915 = vmatmul.bf16.vlgmr.msra.gmra.mxu0 %v2989_v50  ;;  %929 = vmatmul.bf16.vlgmr.msra.gmra.mxu1 %v2989_v50 }
  0xdd   :  { %943 = vmatmul.bf16.vlgmr.msra.gmra.mxu2 %v2989_v50  ;;  %957 = vmatmul.bf16.vlgmr.msra.gmra.mxu3 %v2989_v50 }
 0x138   :  { %v3003_v12 = vpop.f32.mrf.mxu0  ;;  %v3005_v13 = vpop.f32.mrf.mxu1 }
 0x13f   :  { %v832_v17 = vpop.f32.mrf.mxu2  ;;  %v846_v18 = vpop.f32.mrf.mxu3 }
 0x140   :  { %v833_v19 = vadd.f32 %v832_v17, %v293_v15  ;;  %v847_v20 = vadd.f32 %v846_v18, %v294_v16  ;;  %v3011_v21 = vpop.f32.mrf.mxu0  ;;  %v3013_v22 = vpop.f32.mrf.mxu1  ;;  %v300_v18 = vperm.slane %v288_v56, 1 }
 0x142   :  { %v964_v23 = vpack.c.bf16 %v847_v20, %v833_v19 }
 0x144   :  { %v987_v30 = vunpack.c.l.b16 %v964_v23  ;;  %v991_v32 = vunpack.c.h.b16 %v964_v23 }
 0x147   :  { %v834_v50 = vpop.f32.mrf.mxu2  ;;  %v848_v24 = vpop.f32.mrf.mxu3 }
 0x148   :  { %v835_v25 = vadd.f32 %v834_v50, %v293_v15  ;;  %v849_v26 = vadd.f32 %v848_v24, %v294_v16  ;;  %v860_v27 = vpop.f32.mrf.mxu0  ;;  %v874_v28 = vpop.f32.mrf.mxu1  ;;  %v299_v15 = vperm.slane %v288_v56, 0 }
 0x149   :  { %v861_v1 = vadd.f32 %v860_v27, %v295_v6  ;;  %v875_v2 = vadd.f32 %v874_v28, %v296_v55 }
 0x14a   :  { %v970_v29 = vpack.c.bf16 %v849_v26, %v835_v25 }
 0x14b   :  { %v965_v11 = vpack.c.bf16 %v875_v2, %v861_v1 }
 0x14c   :  { %v988_v31 = vunpack.c.l.b16 %v970_v29  ;;  %v992_v33 = vunpack.c.h.b16 %v970_v29 }
 0x14d   :  { %v1001_v27 = vunpack.c.h.b16 %v965_v11 }
 0x14e   :  { %v3015_v34 = vpack.c.b16 %v988_v31, %v987_v30  ;;  %v3017_v35 = vpack.c.b16 %v992_v33, %v991_v32  ;;  %v291_v32 = vperm.slane %v3007_v14, 0 }
 0x14f   :  { %v888_v36 = vpop.f32.mrf.mxu2  ;;  %v902_v37 = vpop.f32.mrf.mxu3 }
 0x150   :  { %v862_v40 = vpop.f32.mrf.mxu0  ;;  %v876_v41 = vpop.f32.mrf.mxu1  ;;  %v889_v42 = vadd.f32 %v888_v36, %v297_v38  ;;  %v903_v43 = vadd.f32 %v902_v37, %v298_v39  ;;  %v292_v36 = vperm.slane %v3007_v14, 1 }
 0x151   :  { %v863_v61 = vadd.f32 %v862_v40, %v295_v6  ;;  %v877_v62 = vadd.f32 %v876_v41, %v296_v55  ;;  %v807_v40 = vadd.f32 %v3011_v21, %v291_v32 }
 0x152   :  { %v966_v46 = vpack.c.bf16 %v903_v43, %v889_v42  ;;  %v821_v41 = vadd.f32 %v3013_v22, %v292_v36 }
 0x153   :  { %v971_v7 = vpack.c.bf16 %v877_v62, %v863_v61  ;;  %v1036_v62 = vld [vmem:[#allocation5 + $0x8] sm:$0xff] }
 0x154   :  { %v1011_v51 = vunpack.c.h.b16 %v966_v46  ;;  %v1007_v3 = vunpack.c.l.b16 %v966_v46  ;;  %v819_v46 = vadd.f32 %v3005_v13, %v292_v36  ;;  %v969_v14 = vpack.c.bf16 %v821_v41, %v807_v40 }
 0x155   :  { %v1002_v50 = vunpack.c.h.b16 %v971_v7 }
 0x156   :  { %v978_v22 = vunpack.c.l.b16 %v969_v14 }
 0x157   :  { %v890_v44 = vpop.f32.mrf.mxu2  ;;  %v904_v45 = vpop.f32.mrf.mxu3  ;;  %v1003_v33 = vpack.c.b16 %v1002_v50, %v1001_v27 }
 0x158   :  { %v891_v47 = vadd.f32 %v890_v44, %v297_v38  ;;  %v905_v48 = vadd.f32 %v904_v45, %v298_v39  ;;  %v998_v44 = vunpack.c.l.b16 %v971_v7  ;;  %v805_v45 = vadd.f32 %v3003_v12, %v291_v32 }
 0x159   :  { %v916_v54 = vpop.f32.mrf.mxu0  ;;  %v930_v0 = vpop.f32.mrf.mxu1  ;;  %v982_v12 = vunpack.c.h.b16 %v969_v14 }
 0x15a   :  { %v972_v49 = vpack.c.bf16 %v905_v48, %v891_v47  ;;  %v917_v28 = vadd.f32 %v916_v54, %v299_v15  ;;  %v931_v29 = vadd.f32 %v930_v0, %v300_v18  ;;  %v963_v54 = vpack.c.bf16 %v819_v46, %v805_v45 }
 0x15c   :  { %v1012_v53 = vunpack.c.h.b16 %v972_v49  ;;  %v1008_v63 = vunpack.c.l.b16 %v972_v49  ;;  %v967_v42 = vpack.c.bf16 %v931_v29, %v917_v28  ;;  %v997_v49 = vunpack.c.l.b16 %v965_v11 }
 0x15d   :  { %v977_v6 = vunpack.c.l.b16 %v963_v54  ;;  %v981_v13 = vunpack.c.h.b16 %v963_v54 }
 0x15e   :  { %v1013_v52 = vpack.c.b16 %v1012_v53, %v1011_v51  ;;  %v1009_v8 = vpack.c.b16 %v1008_v63, %v1007_v3  ;;  %v1021_v51 = vunpack.c.h.b16 %v967_v42  ;;  %v999_v53 = vpack.c.b16 %v998_v44, %v997_v49  ;;  %v1037_v3 = vld [vmem:[#allocation5 + $0x10] sm:$0xff] }
 0x15f   :  { %v979_v56 = vpack.c.b16 %v978_v22, %v977_v6 }
 0x160   :  { %v944_v57 = vpop.f32.mrf.mxu2  ;;  %v958_v58 = vpop.f32.mrf.mxu3  ;;  %1047 = vmatpush.bf16.xpose.msrb.mxu0 %v1013_v52  ;;  %v1017_v52 = vunpack.c.l.b16 %v967_v42 }
 0x161   :  { %v945_v4 = vadd.f32 %v944_v57, %v301_v59  ;;  %v959_v5 = vadd.f32 %v958_v58, %v302_v60  ;;  %v918_v9 = vpop.f32.mrf.mxu0  ;;  %v932_v10 = vpop.f32.mrf.mxu1  ;;  %v983_v57 = vpack.c.b16 %v982_v12, %v981_v13  ;;  %v1035_v58 = vld [vmem:[#allocation5] sm:$0xff] }
 0x162   :  { %v919_v24 = vadd.f32 %v918_v9, %v299_v15  ;;  %v933_v25 = vadd.f32 %v932_v10, %v300_v18  ;;  %v1039_v10 = vld [vmem:[#allocation5 + $0x20] sm:$0xff] }
 0x163   :  { %v968_v19 = vpack.c.bf16 %v959_v5, %v945_v4 }
 0x164   :  { %v973_v37 = vpack.c.bf16 %v933_v25, %v919_v24 }
 0x165   :  { %v1031_v30 = vunpack.c.h.b16 %v968_v19  ;;  %v1027_v43 = vunpack.c.l.b16 %v968_v19 }
 0x166   :  { %v1022_v47 = vunpack.c.h.b16 %v973_v37  ;;  %v1018_v0 = vunpack.c.l.b16 %v973_v37 }
 0x168   :  { %v946_v16 = vpop.f32.mrf.mxu2  ;;  %v960_v17 = vpop.f32.mrf.mxu3  ;;  %1048 = vmatpush.bf16.xpose.msrb.mxu0 %v1009_v8  ;;  %v1023_v21 = vpack.c.b16 %v1022_v47, %v1021_v51  ;;  %v1019_v55 = vpack.c.b16 %v1018_v0, %v1017_v52 }
 0x169   :  { %v947_v20 = vadd.f32 %v946_v16, %v301_v59  ;;  %v961_v23 = vadd.f32 %v960_v17, %v302_v60  ;;  %v1040_v17 = vld [vmem:[#allocation5 + $0x28] sm:$0xff] }
 0x16b   :  { %v974_v26 = vpack.c.bf16 %v961_v23, %v947_v20  ;;  %v1041_v23 = vld [vmem:[#allocation5 + $0x30] sm:$0xff] }
 0x16d   :  { %v1032_v31 = vunpack.c.h.b16 %v974_v26  ;;  %v1028_v38 = vunpack.c.l.b16 %v974_v26  ;;  %v1042_v26 = vld [vmem:[#allocation5 + $0x38] sm:$0xff] }
 0x16f   :  { %v1033_v39 = vpack.c.b16 %v1032_v31, %v1031_v30  ;;  %v1029_v48 = vpack.c.b16 %v1028_v38, %v1027_v43 }
 0x170   :  { %1049 = vmatpush.bf16.xpose.msrb.mxu0 %v1003_v33 }
 0x171   :  { %1181 = vmatpush.bf16.msrb.mxu1 %v1033_v39 }
 0x175   :  { %1182 = vmatpush.bf16.msrb.mxu1 %v1029_v48 }
 0x178   :  { %1050 = vmatpush.bf16.xpose.msrb.mxu0 %v999_v53 }
 0x179   :  { %1183 = vmatpush.bf16.msrb.mxu1 %v1023_v21 }
 0x17d   :  { %1184 = vmatpush.bf16.msrb.mxu1 %v1019_v55 }
 0x17f   :  { %1051 = vmatmul.bf16.vlgmr.msrb.gmra.mxu0 %v979_v56 }
 0x18f   :  { %1056 = vmatmul.bf16.gmra.mxu0 %v983_v57 }
 0x19f   :  { %1061 = vmatmul.bf16.gmra.mxu0 %v3015_v34 }
 0x1af   :  { %1066 = vmatmul.bf16.gmra.mxu0 %v3017_v35  ;;  %v1038_v35 = vld [vmem:[#allocation5 + $0x18] sm:$0xff] }
 0x1fc   :  { %v1052_v59 = vpop.f32.mrf.mxu0 }
 0x1fd   :  { %v1053_v60 = vadd.f32 %v1052_v59, %v1035_v58 }
 0x1ff   :  { %v1073_v61 = vsel %vm1072_vm6, %v1053_v60, -inf }
 0x200   :  { %1074 = vmax.xlane.f32.xlu2 %v1073_v61 }
 0x204   :  { %v1054_v63 = vpop.f32.mrf.mxu0 }
 0x205   :  { %v1055_v1 = vadd.f32 %v1054_v63, %v1036_v62 }
 0x207   :  { %v1076_v2 = vsel %vm1072_vm6, %v1055_v1, -inf }
 0x208   :  { %1077 = vmax.xlane.f32.xlu2 %v1076_v2 }
 0x20c   :  { %v1057_v4 = vpop.f32.mrf.mxu0 }
 0x20d   :  { %v1058_v5 = vadd.f32 %v1057_v4, %v1037_v3 }
 0x20f   :  { %v1079_v34 = vsel %vm1072_vm6, %v1058_v5, -inf }
 0x210   :  { %1080 = vmax.xlane.f32.xlu0 %v1079_v34 }
 0x214   :  { %v1059_v7 = vpop.f32.mrf.mxu0 }
 0x215   :  { %v1060_v8 = vadd.f32 %v1059_v7, %v1038_v35 }
 0x217   :  { %v1082_v9 = vsel %vm1072_vm6, %v1060_v8, -inf }
 0x218   :  { %1083 = vmax.xlane.f32.xlu1 %v1082_v9 }
 0x21c   :  { %v1062_v11 = vpop.f32.mrf.mxu0 }
 0x21d   :  { %v1063_v15 = vadd.f32 %v1062_v11, %v1039_v10 }
 0x21f   :  { %v1085_v16 = vsel %vm1072_vm6, %v1063_v15, -inf }
 0x220   :  { %1086 = vmax.xlane.f32.xlu2 %v1085_v16 }
 0x224   :  { %v1064_v18 = vpop.f32.mrf.mxu0 }
 0x225   :  { %v1065_v19 = vadd.f32 %v1064_v18, %v1040_v17 }
 0x227   :  { %v1088_v20 = vsel %vm1072_vm6, %v1065_v19, -inf }
 0x228   :  { %1089 = vmax.xlane.f32.xlu0 %v1088_v20  ;;  %v2557_v20 = vld [vmem:[#allocation10 + $0x38] sm:$0xff] }
 0x229   :  { %1494 = vmatpush.bf16.msrb.mxu2 %v2557_v20 }
 0x22c   :  { %v1067_v50 = vpop.f32.mrf.mxu0 }
 0x22d   :  { %v1068_v24 = vadd.f32 %v1067_v50, %v1041_v23  ;;  %v2556_v23 = vld [vmem:[#allocation10 + $0x30] sm:$0xff] }
 0x22e   :  { %1495 = vmatpush.bf16.msrb.mxu2 %v2556_v23 }
 0x22f   :  { %v1091_v25 = vsel %vm1072_vm6, %v1068_v24, -inf }
 0x230   :  { %1092 = vmax.xlane.f32.xlu1 %v1091_v25 }
 0x234   :  { %v1069_v27 = vpop.f32.mrf.mxu0 }
 0x235   :  { %v1070_v28 = vadd.f32 %v1069_v27, %v1042_v26  ;;  %v2554_v26 = vld [vmem:[#allocation10 + $0x20] sm:$0xff] }
 0x237   :  { %v1094_v29 = vsel %vm1072_vm6, %v1070_v28, -inf }
 0x238   :  { %1095 = vmax.xlane.f32.xlu2 %v1094_v29 }
 0x273   :  { %v1075_v30 = vpop.xlane.xlu2 %1074 }
 0x274   :  { %v1097_v31 = vsub.f32 %v1053_v60, %v1075_v30 }
 0x276   :  { %v1105_v32 = vmul.f32 1.442695, %v1097_v31 }
 0x278   :  { %2619 = vpow2.f32 %v1105_v32 }
 0x27b   :  { %v1078_v33 = vpop.xlane.xlu2 %1077 }
 0x27c   :  { %v1098_v36 = vsub.f32 %v1055_v1, %v1078_v33 }
 0x27e   :  { %v2620_v37 = vpop.eup %2619  ;;  %v1107_v38 = vmul.f32 1.442695, %v1098_v36 }
 0x27f   :  { %v1121_v39 = vsel %vm1072_vm6, %v2620_v37, 0.0 }
 0x280   :  { %2621 = vpow2.f32 %v1107_v38  ;;  %1122 = vadd.xlane.f32.xlu0 %v1121_v39 }
 0x283   :  { %v1081_v40 = vpop.xlane.xlu0 %1080 }
 0x284   :  { %v1099_v41 = vsub.f32 %v1058_v5, %v1081_v40  ;;  %v2553_v40 = vld [vmem:[#allocation10 + $0x18] sm:$0xff] }
 0x286   :  { %v2622_v42 = vpop.eup %2621  ;;  %v1109_v43 = vmul.f32 1.442695, %v1099_v41  ;;  %v2565_v41 = vld [vmem:[#allocation10 + $0x78] sm:$0xff] }
 0x287   :  { %v1124_v44 = vsel %vm1072_vm6, %v2622_v42, 0.0  ;;  %1508 = vmatpush.bf16.msrb.mxu3 %v2565_v41 }
 0x288   :  { %2623 = vpow2.f32 %v1109_v43  ;;  %1125 = vadd.xlane.f32.xlu1 %v1124_v44  ;;  %v2564_v43 = vld [vmem:[#allocation10 + $0x70] sm:$0xff]  ;;  %v2551_v44 = vld [vmem:[#allocation10 + $0x8] sm:$0xff] }
 0x28b   :  { %v1084_v45 = vpop.xlane.xlu1 %1083  ;;  %1509 = vmatpush.bf16.msrb.mxu3 %v2564_v43 }
 0x28c   :  { %v1100_v46 = vsub.f32 %v1060_v8, %v1084_v45  ;;  %v2563_v45 = vld [vmem:[#allocation10 + $0x68] sm:$0xff] }
 0x28e   :  { %v2624_v47 = vpop.eup %2623  ;;  %v1111_v48 = vmul.f32 1.442695, %v1100_v46  ;;  %v2550_v46 = vld [vmem:[#allocation10] sm:$0xff] }
 0x28f   :  { %v1127_v49 = vsel %vm1072_vm6, %v2624_v47, 0.0  ;;  %1510 = vmatpush.bf16.msrb.mxu3 %v2563_v45  ;;  %v2612_v45 = vld [vmem:[%s3101_s5] ss:$0 sm:$0xff] }
 0x290   :  { %2625 = vpow2.f32 %v1111_v48  ;;  %1128 = vadd.xlane.f32.xlu2 %v1127_v49  ;;  %v2561_v48 = vld [vmem:[#allocation10 + $0x58] sm:$0xff] }
 0x291   :  { %v2573_v49 = vld [vmem:[#allocation10 + $0xb8] sm:$0xff] }
 0x293   :  { %v1087_v14 = vpop.xlane.xlu2 %1086 }
 0x294   :  { %v1101_v51 = vsub.f32 %v1063_v15, %v1087_v14  ;;  %v2560_v14 = vld [vmem:[#allocation10 + $0x50] sm:$0xff] }
 0x296   :  { %v2626_v53 = vpop.eup %2625  ;;  %v1113_v54 = vmul.f32 1.442695, %v1101_v51  ;;  %v2572_v51 = vld [vmem:[#allocation10 + $0xb0] sm:$0xff] }
 0x297   :  { %v1130_v0 = vsel %vm1072_vm6, %v2626_v53, 0.0 }
 0x298   :  { %2627 = vpow2.f32 %v1113_v54  ;;  %1131 = vadd.xlane.f32.xlu0 %v1130_v0  ;;  %v2571_v54 = vld [vmem:[#allocation10 + $0xa8] sm:$0xff]  ;;  %v2558_v0 = vld [vmem:[#allocation10 + $0x40] sm:$0xff] }
 0x29b   :  { %v1090_v21 = vpop.xlane.xlu0 %1089 }
 0x29c   :  { %v1102_v22 = vsub.f32 %v1065_v19, %v1090_v21  ;;  %v2570_v21 = vld [vmem:[#allocation10 + $0xa0] sm:$0xff] }
 0x29e   :  { %v2628_v52 = vpop.eup %2627  ;;  %v1115_v6 = vmul.f32 1.442695, %v1102_v22  ;;  %v2569_v22 = vld [vmem:[#allocation10 + $0x98] sm:$0xff] }
 0x29f   :  { %v1133_v55 = vsel %vm1072_vm6, %v2628_v52, 0.0 }
 0x2a0   :  { %2629 = vpow2.f32 %v1115_v6  ;;  %1134 = vadd.xlane.f32.xlu1 %v1133_v55  ;;  %v2568_v55 = vld [vmem:[#allocation10 + $0x90] sm:$0xff] }
 0x2a3   :  { %v1093_v56 = vpop.xlane.xlu1 %1092 }
 0x2a4   :  { %v1103_v12 = vsub.f32 %v1068_v24, %v1093_v56  ;;  %v2555_v24 = vld [vmem:[#allocation10 + $0x28] sm:$0xff]  ;;  %v2580_v56 = vld [vmem:[#allocation10 + $0xf0] sm:$0xff] }
 0x2a5   :  { %1496 = vmatpush.bf16.msrb.mxu2 %v2555_v24 }
 0x2a6   :  { %v2630_v13 = vpop.eup %2629  ;;  %v1117_v57 = vmul.f32 1.442695, %v1103_v12 }
 0x2a7   :  { %v1136_v58 = vsel %vm1072_vm6, %v2630_v13, 0.0 }
 0x2a8   :  { %2631 = vpow2.f32 %v1117_v57  ;;  %1137 = vadd.xlane.f32.xlu2 %v1136_v58  ;;  %v2579_v57 = vld [vmem:[#allocation10 + $0xe8] sm:$0xff] }
 0x2a9   :  { %1497 = vmatpush.bf16.msrb.mxu2 %v2554_v26 }
 0x2ab   :  { %v1096_v59 = vpop.xlane.xlu2 %1095 }
 0x2ac   :  { %v1104_v60 = vsub.f32 %v1070_v28, %v1096_v59 }
 0x2ad   :  { %1498 = vmatpush.bf16.msrb.mxu2 %v2553_v40  ;;  %v2586_v40 = vld [vmem:[#allocation11 + $0x20] sm:$0xff] }
 0x2ae   :  { %v2632_v61 = vpop.eup %2631  ;;  %v1119_v62 = vmul.f32 1.442695, %v1104_v60 }
 0x2af   :  { %v1139_v63 = vsel %vm1072_vm6, %v2632_v61, 0.0 }
 0x2b0   :  { %2633 = vpow2.f32 %v1119_v62  ;;  %1140 = vadd.xlane.f32.xlu0 %v1139_v63  ;;  %v2566_v62 = vld [vmem:[#allocation10 + $0x80] sm:$0xff] }
 0x2b1   :  { %v2578_v63 = vld [vmem:[#allocation10 + $0xe0] sm:$0xff] }
 0x2b6   :  { %v2634_v1 = vpop.eup %2633 }
 0x2b7   :  { %v1142_v2 = vsel %vm1072_vm6, %v2634_v1, 0.0 }
 0x2b8   :  { %1143 = vadd.xlane.f32.xlu1 %v1142_v2  ;;  %v2577_v2 = vld [vmem:[#allocation10 + $0xd8] sm:$0xff] }
 0x2f3   :  { %v1123_v3 = vpop.xlane.xlu0 %1122 }
 0x2f4   :  { %2635 = vrcp.f32 %v1123_v3 }
 0x2fa   :  { %v2636_v5 = vpop.eup %2635 }
 0x2fb   :  { %v1126_v4 = vpop.xlane.xlu1 %1125  ;;  %v1153_v35 = vmul.f32 %v2636_v5, %v2620_v37 }
 0x2fc   :  { %2637 = vrcp.f32 %v1126_v4  ;;  %v2576_v4 = vld [vmem:[#allocation10 + $0xd0] sm:$0xff] }
 0x302   :  { %v2638_v34 = vpop.eup %2637 }
 0x303   :  { %v1154_v7 = vmul.f32 %v2638_v34, %v2622_v42  ;;  %v1129_v9 = vpop.xlane.xlu2 %1128  ;;  %v2552_v42 = vld [vmem:[#allocation10 + $0x10] sm:$0xff]  ;;  %v2575_v34 = vld [vmem:[#allocation10 + $0xc8] sm:$0xff] }
 0x304   :  { %2639 = vrcp.f32 %v1129_v9  ;;  %1499 = vmatpush.bf16.msrb.mxu2 %v2552_v42 }
 0x305   :  { %v1161_v8 = vpack.c.bf16 %v1154_v7, %v1153_v35 }
 0x307   :  { %2258 = vmatmul.msk.bf16.vlgmr.msrb.gmra.mxu1 %vm1072_vm6, %v1161_v8 }
 0x308   :  { %1500 = vmatpush.bf16.msrb.mxu2 %v2551_v44 }
 0x30a   :  { %v2640_v11 = vpop.eup %2639 }
 0x30b   :  { %v1132_v10 = vpop.xlane.xlu0 %1131  ;;  %v1155_v16 = vmul.f32 %v2640_v11, %v2624_v47  ;;  %v2562_v47 = vld [vmem:[#allocation10 + $0x60] sm:$0xff] }
 0x30c   :  { %2641 = vrcp.f32 %v1132_v10  ;;  %1501 = vmatpush.bf16.msrb.mxu2 %v2550_v46  ;;  %1511 = vmatpush.bf16.msrb.mxu3 %v2562_v47  ;;  %v2574_v10 = vld [vmem:[#allocation10 + $0xc0] sm:$0xff] }
 0x30d   :  { %v2663_v46 = vld [vmem:[#allocation2] sm:$0xff] }
 0x310   :  { %1512 = vmatpush.bf16.msrb.mxu3 %v2561_v48  ;;  %1522 = vmatpush.bf16.msra.mxu2 %v2573_v49 }
 0x312   :  { %v2642_v15 = vpop.eup %2641 }
 0x313   :  { %v1156_v17 = vmul.f32 %v2642_v15, %v2626_v53  ;;  %v1135_v19 = vpop.xlane.xlu1 %1134  ;;  %v2559_v53 = vld [vmem:[#allocation10 + $0x48] sm:$0xff] }
 0x314   :  { %2643 = vrcp.f32 %v1135_v19  ;;  %1513 = vmatpush.bf16.msrb.mxu3 %v2560_v14  ;;  %1523 = vmatpush.bf16.msra.mxu2 %v2572_v51 }
 0x315   :  { %v1162_v18 = vpack.c.bf16 %v1156_v17, %v1155_v16 }
 0x317   :  { %2259 = vmatmul.msk.bf16.gmra.mxu1 %vm1072_vm6, %v1162_v18 }
 0x318   :  { %1514 = vmatpush.bf16.msrb.mxu3 %v2559_v53  ;;  %1524 = vmatpush.bf16.msra.mxu2 %v2571_v54 }
 0x31a   :  { %v2644_v25 = vpop.eup %2643 }
 0x31b   :  { %v1138_v50 = vpop.xlane.xlu2 %1137  ;;  %v1157_v28 = vmul.f32 %v2644_v25, %v2628_v52  ;;  %v2581_v52 = vld [vmem:[#allocation10 + $0xf8] sm:$0xff] }
 0x31c   :  { %2645 = vrcp.f32 %v1138_v50  ;;  %1515 = vmatpush.bf16.msrb.mxu3 %v2558_v0  ;;  %1525 = vmatpush.bf16.msra.mxu2 %v2570_v21  ;;  %v2664_v21 = vld [vmem:[#allocation2 + $0x8] sm:$0xff] }
 0x320   :  { %1526 = vmatpush.bf16.msra.mxu2 %v2569_v22  ;;  %1536 = vmatpush.bf16.msra.mxu3 %v2581_v52 }
 0x322   :  { %v2646_v27 = vpop.eup %2645 }
 0x323   :  { %v1158_v29 = vmul.f32 %v2646_v27, %v2630_v13  ;;  %v1141_v31 = vpop.xlane.xlu0 %1140  ;;  %v2567_v13 = vld [vmem:[#allocation10 + $0x88] sm:$0xff] }
 0x324   :  { %2647 = vrcp.f32 %v1141_v31  ;;  %1527 = vmatpush.bf16.msra.mxu2 %v2568_v55  ;;  %1537 = vmatpush.bf16.msra.mxu3 %v2580_v56  ;;  %v2585_v55 = vld [vmem:[#allocation11 + $0x18] sm:$0xff]  ;;  %v2584_v56 = vld [vmem:[#allocation11 + $0x10] sm:$0xff] }
 0x325   :  { %v1163_v30 = vpack.c.bf16 %v1158_v29, %v1157_v28 }
 0x327   :  { %2260 = vmatmul.msk.bf16.gmra.mxu1 %vm1072_vm6, %v1163_v30 }
 0x328   :  { %1528 = vmatpush.bf16.msra.mxu2 %v2567_v13  ;;  %1538 = vmatpush.bf16.msra.mxu3 %v2579_v57 }
 0x32a   :  { %v2648_v33 = vpop.eup %2647 }
 0x32b   :  { %v1144_v32 = vpop.xlane.xlu1 %1143  ;;  %v1159_v37 = vmul.f32 %v2648_v33, %v2632_v61 }
 0x32c   :  { %2649 = vrcp.f32 %v1144_v32  ;;  %1529 = vmatpush.bf16.msra.mxu2 %v2566_v62  ;;  %1539 = vmatpush.bf16.msra.mxu3 %v2578_v63  ;;  %v2589_v32 = vld [vmem:[#allocation11 + $0x38] sm:$0xff] }
 0x32d   :  { %1671 = vmatpush.bf16.msra.mxu1 %v2589_v32 }
 0x330   :  { %1540 = vmatpush.bf16.msra.mxu3 %v2577_v2 }
 0x332   :  { %v2650_v36 = vpop.eup %2649 }
 0x333   :  { %v1160_v38 = vmul.f32 %v2650_v36, %v2634_v1  ;;  %v2588_v36 = vld [vmem:[#allocation11 + $0x30] sm:$0xff] }
 0x334   :  { %1541 = vmatpush.bf16.msra.mxu3 %v2576_v4  ;;  %1672 = vmatpush.bf16.msra.mxu1 %v2588_v36  ;;  %v2597_v36 = vld [vmem:[#allocation13 + $0x38] sm:$0xff] }
 0x335   :  { %v1164_v39 = vpack.c.bf16 %v1160_v38, %v1159_v37  ;;  %v2587_v37 = vld [vmem:[#allocation11 + $0x28] sm:$0xff]  ;;  %1834 = vmatpush.bf16.msra.mxu0 %v2597_v36 }
 0x337   :  { %2261 = vmatmul.msk.bf16.gmra.mxu1 %vm1072_vm6, %v1164_v39 }
 0x338   :  { %1542 = vmatpush.bf16.msra.mxu3 %v2575_v34  ;;  %1673 = vmatpush.bf16.msra.mxu1 %v2587_v37 }
 0x33c   :  { %1543 = vmatpush.bf16.msra.mxu3 %v2574_v10  ;;  %1674 = vmatpush.bf16.msra.mxu1 %v2586_v40  ;;  %v2596_v40 = vld [vmem:[#allocation13 + $0x30] sm:$0xff] }
 0x33d   :  { %1835 = vmatpush.bf16.msra.mxu0 %v2596_v40 }
 0x340   :  { %1675 = vmatpush.bf16.msra.mxu1 %v2585_v55  ;;  %v2592_v55 = vld [vmem:[#allocation13 + $0x10] sm:$0xff] }
 0x344   :  { %1676 = vmatpush.bf16.msra.mxu1 %v2584_v56 }
 0x384   :  { %v1186_v6 = vpop.f32.mrf.mxu1 }
 0x385   :  { %v1206_v12 = vpack.c.bf16 %v1186_v6, %v1186_v6 }
 0x387   :  { %v1216_v60 = vunpack.c.l.b16 %v1206_v12  ;;  %v2583_v12 = vld [vmem:[#allocation11 + $0x8] sm:$0xff] }
 0x388   :  { %1677 = vmatpush.bf16.msra.mxu1 %v2583_v12 }
 0x38c   :  { %v1188_v58 = vpop.f32.mrf.mxu1 }
 0x38d   :  { %v1207_v59 = vpack.c.bf16 %v1188_v58, %v1188_v58 }
 0x38f   :  { %v1217_v61 = vunpack.c.l.b16 %v1207_v59  ;;  %v2582_v59 = vld [vmem:[#allocation11] sm:$0xff] }
 0x390   :  { %1678 = vmatpush.bf16.msra.mxu1 %v2582_v59 }
 0x391   :  { %v1218_v1 = vpack.c.b16 %v1217_v61, %v1216_v60 }
 0x393   :  { %1502 = vmatmul.bf16.vlgmr.msrb.gmra.mxu2 %v1218_v1 }
 0x394   :  { %v1191_v3 = vpop.f32.mrf.mxu1 }
 0x395   :  { %v1208_v5 = vpack.c.bf16 %v1191_v3, %v1191_v3 }
 0x397   :  { %v1222_v8 = vunpack.c.l.b16 %v1208_v5 }
 0x39c   :  { %v1193_v35 = vpop.f32.mrf.mxu1 }
 0x39d   :  { %v1209_v7 = vpack.c.bf16 %v1193_v35, %v1193_v35 }
 0x39f   :  { %v1223_v9 = vunpack.c.l.b16 %v1209_v7 }
 0x3a1   :  { %v1224_v11 = vpack.c.b16 %v1223_v9, %v1222_v8 }
 0x3a3   :  { %1516 = vmatmul.bf16.vlgmr.msrb.gmra.mxu3 %v1224_v11 }
 0x3a4   :  { %v1196_v15 = vpop.f32.mrf.mxu1 }
 0x3a5   :  { %v1210_v16 = vpack.c.bf16 %v1196_v15, %v1196_v15 }
 0x3a7   :  { %v1228_v19 = vunpack.c.l.b16 %v1210_v16 }
 0x3ac   :  { %v1198_v17 = vpop.f32.mrf.mxu1 }
 0x3ad   :  { %v1211_v18 = vpack.c.bf16 %v1198_v17, %v1198_v17 }
 0x3af   :  { %v1229_v20 = vunpack.c.l.b16 %v1211_v18 }
 0x3b1   :  { %v1230_v23 = vpack.c.b16 %v1229_v20, %v1228_v19 }
 0x3b3   :  { %1530 = vmatmul.bf16.vlgmr.msra.gmra.mxu2 %v1230_v23 }
 0x3b4   :  { %v1201_v50 = vpop.f32.mrf.mxu1 }
 0x3b5   :  { %v1212_v24 = vpack.c.bf16 %v1201_v50, %v1201_v50 }
 0x3b7   :  { %v1234_v27 = vunpack.c.l.b16 %v1212_v24 }
 0x3bc   :  { %v1203_v25 = vpop.f32.mrf.mxu1 }
 0x3bd   :  { %v1213_v26 = vpack.c.bf16 %v1203_v25, %v1203_v25 }
 0x3bf   :  { %v1235_v28 = vunpack.c.l.b16 %v1213_v26 }
 0x3c1   :  { %v1236_v29 = vpack.c.b16 %v1235_v28, %v1234_v27 }
 0x3c3   :  { %1544 = vmatmul.bf16.vlgmr.msra.gmra.mxu3 %v1236_v29 }
 0x416   :  { %v1503_v30 = vpop.f32.mrf.mxu2 }
 0x41e   :  { %v1505_v33 = vpop.f32.mrf.mxu2 }
 0x426   :  { %v1517_v31 = vpop.f32.mrf.mxu3 }
 0x427   :  { %v1518_v41 = vadd.f32 %v1517_v31, %v1503_v30  ;;  %v2613_v30 = vld [vmem:[%s3103_s7] ss:$0 sm:$0xff] }
 0x42e   :  { %v1519_v38 = vpop.f32.mrf.mxu3 }
 0x42f   :  { %v1520_v49 = vadd.f32 %v1519_v38, %v1505_v33 }
 0x436   :  { %v1531_v39 = vpop.f32.mrf.mxu2 }
 0x437   :  { %v1532_v42 = vadd.f32 %v1531_v39, %v1518_v41 }
 0x43e   :  { %v1533_v48 = vpop.f32.mrf.mxu2 }
 0x43f   :  { %v1534_v51 = vadd.f32 %v1533_v48, %v1520_v49 }
 0x446   :  { %v1545_v43 = vpop.f32.mrf.mxu3 }
 0x447   :  { %v1546_v44 = vadd.f32 %v1545_v43, %v1532_v42 }
 0x449   :  { %v1550_v47 = vadd.f32 %v2663_v46, %v1546_v44  ;;  %v2595_v44 = vld [vmem:[#allocation13 + $0x28] sm:$0xff] }
 0x44a   :  { %1836 = vmatpush.bf16.msra.mxu0 %v2595_v44 }
 0x44b   :  { %v3054_v14 = vadd.f32 %v2612_v45, %v1550_v47  ;;  %v2594_v47 = vld [vmem:[#allocation13 + $0x20] sm:$0xff] }
 0x44d   :  { %1558 = vadd.xlane.f32.xlu2 %v3054_v14  ;;  %v1564_v53 = vmul.f32 %v3054_v14, %v3054_v14 }
 0x44e   :  { %v1547_v54 = vpop.f32.mrf.mxu3  ;;  %1837 = vmatpush.bf16.msra.mxu0 %v2594_v47 }
 0x44f   :  { %v1548_v0 = vadd.f32 %v1547_v54, %v1534_v51  ;;  %1566 = vadd.xlane.f32.xlu1 %v1564_v53  ;;  %v2593_v54 = vld [vmem:[#allocation13 + $0x18] sm:$0xff] }
 0x451   :  { %v1551_v22 = vadd.f32 %v2664_v21, %v1548_v0 }
 0x452   :  { %1838 = vmatpush.bf16.msra.mxu0 %v2593_v54 }
 0x453   :  { %v3059_v52 = vadd.f32 %v2612_v45, %v1551_v22 }
 0x455   :  { %1560 = vadd.xlane.f32.xlu0 %v3059_v52  ;;  %v1565_v6 = vmul.f32 %v3059_v52, %v3059_v52 }
 0x456   :  { %1839 = vmatpush.bf16.msra.mxu0 %v2592_v55 }
 0x457   :  { %1568 = vadd.xlane.f32.xlu2 %v1565_v6 }
 0x4c0   :  { %v1559_v13 = vpop.xlane.xlu2 %1558 }
 0x4c1   :  { %v1562_v57 = vmul.f32 0.03125, %v1559_v13 }
 0x4c2   :  { %v1567_v58 = vpop.xlane.xlu1 %1566 }
 0x4c3   :  { %v1572_v60 = vmul.f32 %v1562_v57, %v1562_v57  ;;  %v1570_v61 = vmul.f32 0.03125, %v1567_v58  ;;  %v1576_v24 = vsub.f32 %v3054_v14, %v1562_v57 }
 0x4c5   :  { %v1574_v62 = vsub.f32 %v1570_v61, %v1572_v60  ;;  %v2591_v61 = vld [vmem:[#allocation13 + $0x8] sm:$0xff] }
 0x4c6   :  { %1840 = vmatpush.bf16.msra.mxu0 %v2591_v61 }
 0x4c7   :  { %v1578_v63 = vadd.f32 1e-05, %v1574_v62 }
 0x4c8   :  { %v1561_v1 = vpop.xlane.xlu0 %1560 }
 0x4c9   :  { %2651 = vrsqrt.f32 %v1578_v63  ;;  %v1563_v2 = vmul.f32 0.03125, %v1561_v1  ;;  %vm1586_vm8 = vweird.f32 %v1578_v63 }
 0x4ca   :  { %v1569_v3 = vpop.xlane.xlu2 %1568 }
 0x4cb   :  { %v1573_v4 = vmul.f32 %v1563_v2, %v1563_v2  ;;  %v1571_v5 = vmul.f32 0.03125, %v1569_v3  ;;  %v1577_v25 = vsub.f32 %v3059_v52, %v1563_v2 }
 0x4cd   :  { %v1575_v34 = vsub.f32 %v1571_v5, %v1573_v4 }
 0x4cf   :  { %v2652_v35 = vpop.eup %2651  ;;  %v1579_v7 = vadd.f32 1e-05, %v1575_v34  ;;  %v2590_v34 = vld [vmem:[#allocation13] sm:$0xff] }
 0x4d0   :  { %v1581_v8 = vmul.f32 %v2652_v35, %v1578_v63  ;;  %vm1587_vm7 = vweird.f32 %v2652_v35  ;;  %1841 = vmatpush.bf16.msra.mxu0 %v2590_v34 }
 0x4d1   :  { %2653 = vrsqrt.f32 %v1579_v7  ;;  %vm1588_vm10 = vmor %vm1586_vm8, %vm1587_vm7  ;;  %vm1596_vm11 = vweird.f32 %v1579_v7 }
 0x4d2   :  { %v1582_v9 = vmul.f32 %v2652_v35, %v1581_v8 }
 0x4d4   :  { %v1583_v10 = vmul.f32 0.5, %v1582_v9 }
 0x4d6   :  { %v1584_v15 = vsub.f32 1.5, %v1583_v10 }
 0x4d7   :  { %v2654_v11 = vpop.eup %2653 }
 0x4d8   :  { %v1591_v16 = vmul.f32 %v2654_v11, %v1579_v7  ;;  %v1585_v18 = vmul.f32 %v2652_v35, %v1584_v15  ;;  %vm1597_vm9 = vweird.f32 %v2654_v11 }
 0x4d9   :  { %vm1598_vm12 = vmor %vm1596_vm11, %vm1597_vm9 }
 0x4da   :  { %v1592_v17 = vmul.f32 %v2654_v11, %v1591_v16  ;;  %v1589_v23 = vsel %vm1588_vm10, %v2652_v35, %v1585_v18 }
 0x4db   :  { %v1600_v27 = vmul.f32 %v1589_v23, %v1576_v24 }
 0x4dc   :  { %v1593_v19 = vmul.f32 0.5, %v1592_v17 }
 0x4de   :  { %v1594_v20 = vsub.f32 1.5, %v1593_v19 }
 0x4e0   :  { %v1595_v50 = vmul.f32 %v2654_v11, %v1594_v20 }
 0x4e2   :  { %v1599_v26 = vsel %vm1598_vm12, %v2654_v11, %v1595_v50 }
 0x4e3   :  { %v1601_v28 = vmul.f32 %v1599_v26, %v1577_v25 }
 0x4e5   :  { %v1602_v29 = vpack.c.bf16 %v1601_v28, %v1600_v27 }
 0x4e7   :  { %1679 = vmatmul.bf16.vlgmr.msra.gmra.mxu1 %v1602_v29 }
 0x564   :  { %v1680_v31 = vpop.f32.mrf.mxu1 }
 0x565   :  { %v3069_v32 = vadd.f32 %v2613_v30, %v1680_v31 }
 0x567   :  { %v3072_v33 = vmul.f32 0.70710677, %v3069_v32 }
 0x569   :  { %v1689_v37 = vand.u32 2147483647, %v3072_v33  ;;  %vm1755_vm5 = vcmp.ge.f32.partialorder %v3072_v33, 0.0  ;;  %v2614_v33 = vld [vmem:[%s3105_s9] ss:$0 sm:$0xff] }
 0x56b   :  { %v1691_v38 = vmul.f32 0.3275911, %v1689_v37  ;;  %v1743_v58 = vsub.f32 0.0, %v1689_v37 }
 0x56c   :  { %v1682_v39 = vpop.f32.mrf.mxu1 }
 0x56d   :  { %v1693_v41 = vadd.f32 1.0, %v1691_v38  ;;  %v3075_v42 = vadd.f32 %v2613_v30, %v1682_v39  ;;  %v1745_v2 = vmul.f32 %v1743_v58, %v1689_v37 }
 0x56f   :  { %2655 = vrcp.f32 %v1693_v41  ;;  %v3078_v43 = vmul.f32 0.70710677, %v3075_v42  ;;  %v1706_v0 = vand.u32 2147483648, %v1693_v41  ;;  %v1704_v22 = vand.u32 2147483647, %v1693_v41 }
 0x570   :  { %vm1700_vm14 = vweird.f32 %v1693_v41  ;;  %v1747_v9 = vmul.f32 1.442695, %v1745_v2 }
 0x571   :  { %v1690_v45 = vand.u32 2147483647, %v3078_v43  ;;  %v1707_v56 = vor.u32 1.1754944e-38, %v1706_v0  ;;  %vm1705_vm0 = vcmp.eq.f32.partialorder %v1704_v22, 8.507059e+37  ;;  %vm1756_vm6 = vcmp.ge.f32.partialorder %v3078_v43, 0.0 }
 0x573   :  { %v1692_v46 = vmul.f32 0.3275911, %v1690_v45  ;;  %v1744_v16 = vsub.f32 0.0, %v1690_v45 }
 0x575   :  { %v2656_v48 = vpop.eup %2655  ;;  %v1694_v51 = vadd.f32 1.0, %v1692_v46  ;;  %v1746_v23 = vmul.f32 %v1744_v16, %v1690_v45 }
 0x576   :  { %v1696_v49 = vmul.f32 %v2656_v48, %v1693_v41  ;;  %vm1701_vm13 = vweird.f32 %v2656_v48 }
 0x577   :  { %2657 = vrcp.f32 %v1694_v51  ;;  %vm1702_vm15 = vmor %vm1700_vm14, %vm1701_vm13  ;;  %v1721_v1 = vand.u32 2147483648, %v1694_v51  ;;  %v1719_v4 = vand.u32 2147483647, %v1694_v51  ;;  %vm1715_vm2 = vweird.f32 %v1694_v51 }
 0x578   :  { %v1697_v53 = vsub.f32 1.0, %v1696_v49  ;;  %2659 = vpow2.f32 %v1747_v9  ;;  %v1749_v27 = vmul.f32 1.442695, %v1746_v23 }
 0x579   :  { %v1722_v8 = vor.u32 1.1754944e-38, %v1721_v1  ;;  %vm1720_vm4 = vcmp.eq.f32.partialorder %v1719_v4, 8.507059e+37 }
 0x57a   :  { %v1698_v21 = vmul.f32 %v2656_v48, %v1697_v53  ;;  %2661 = vpow2.f32 %v1749_v27  ;;  %v1686_v53 = vmul.f32 0.5, %v3075_v42 }
 0x57c   :  { %v1699_v6 = vadd.f32 %v2656_v48, %v1698_v21 }
 0x57d   :  { %v2658_v12 = vpop.eup %2657 }
 0x57e   :  { %v1703_v13 = vsel %vm1702_vm15, %v2656_v48, %v1699_v6  ;;  %v1711_v59 = vmul.f32 %v2658_v12, %v1694_v51  ;;  %vm1716_vm1 = vweird.f32 %v2658_v12  ;;  %v2660_v28 = vpop.eup %2659  ;;  %v1685_v51 = vmul.f32 0.5, %v3069_v32 }
 0x57f   :  { %v1708_v57 = vsel %vm1705_vm0, %v1707_v56, %v1703_v13  ;;  %vm1717_vm3 = vmor %vm1715_vm2, %vm1716_vm1 }
 0x580   :  { %v1725_v60 = vmul.f32 1.0614054, %v1708_v57  ;;  %v1712_v62 = vsub.f32 1.0, %v1711_v59  ;;  %v2662_v41 = vpop.eup %2661 }
 0x582   :  { %v1727_v63 = vadd.f32 -1.4531521, %v1725_v60  ;;  %v1713_v3 = vmul.f32 %v2658_v12, %v1712_v62 }
 0x584   :  { %v1729_v5 = vmul.f32 %v1727_v63, %v1708_v57  ;;  %v1714_v35 = vadd.f32 %v2658_v12, %v1713_v3 }
 0x586   :  { %v1731_v7 = vadd.f32 1.4214138, %v1729_v5  ;;  %v1718_v10 = vsel %vm1717_vm3, %v2658_v12, %v1714_v35 }
 0x587   :  { %v1723_v15 = vsel %vm1720_vm4, %v1722_v8, %v1718_v10 }
 0x588   :  { %v1733_v11 = vmul.f32 %v1731_v7, %v1708_v57  ;;  %v1726_v17 = vmul.f32 1.0614054, %v1723_v15 }
 0x58a   :  { %v1735_v18 = vadd.f32 -0.28449672, %v1733_v11  ;;  %v1728_v19 = vadd.f32 -1.4531521, %v1726_v17 }
 0x58c   :  { %v1737_v20 = vmul.f32 %v1735_v18, %v1708_v57  ;;  %v1730_v50 = vmul.f32 %v1728_v19, %v1723_v15 }
 0x58e   :  { %v1739_v24 = vadd.f32 0.2548296, %v1737_v20  ;;  %v1732_v25 = vadd.f32 1.4214138, %v1730_v50 }
 0x590   :  { %v1741_v26 = vmul.f32 %v1739_v24, %v1708_v57  ;;  %v1734_v29 = vmul.f32 %v1732_v25, %v1723_v15 }
 0x592   :  { %v1751_v30 = vmul.f32 %v2660_v28, %v1741_v26  ;;  %v1736_v31 = vadd.f32 -0.28449672, %v1734_v29 }
 0x594   :  { %v1753_v36 = vsub.f32 1.0, %v1751_v30  ;;  %v1738_v37 = vmul.f32 %v1736_v31, %v1723_v15 }
 0x596   :  { %v1740_v38 = vadd.f32 0.2548296, %v1738_v37  ;;  %v1757_v39 = vsub.f32 0.0, %v1753_v36 }
 0x598   :  { %v1742_v40 = vmul.f32 %v1740_v38, %v1723_v15  ;;  %v1759_v45 = vsel %vm1755_vm5, %v1753_v36, %v1757_v39 }
 0x599   :  { %v1761_v48 = vadd.f32 1.0, %v1759_v45 }
 0x59a   :  { %v1752_v44 = vmul.f32 %v2662_v41, %v1742_v40 }
 0x59b   :  { %v1763_v0 = vmul.f32 %v1761_v48, %v1685_v51 }
 0x59c   :  { %v1754_v46 = vsub.f32 1.0, %v1752_v44 }
 0x59e   :  { %v1758_v47 = vsub.f32 0.0, %v1754_v46 }
 0x5a0   :  { %v1760_v49 = vsel %vm1756_vm6, %v1754_v46, %v1758_v47 }
 0x5a1   :  { %v1762_v54 = vadd.f32 1.0, %v1760_v49 }
 0x5a3   :  { %v1764_v21 = vmul.f32 %v1762_v54, %v1686_v53 }
 0x5a5   :  { %v1765_v22 = vpack.c.bf16 %v1764_v21, %v1763_v0 }
 0x5a7   :  { %1842 = vmatmul.bf16.vlgmr.msra.gmra.mxu0 %v1765_v22 }
 0x624   :  { %v1843_v6 = vpop.f32.mrf.mxu0 }
 0x625   :  { %v1844_v55 = vadd.f32 %v2614_v33, %v1843_v6 }
 0x627   :  { %v1848_v56 = vadd.f32 %v1844_v55, %v3054_v14 }
 0x629   :  { %1850 = vst [vmem:[#allocation14] sm:$0xff] %v1848_v56 }
 0x62c   :  { %v1845_v43 = vpop.f32.mrf.mxu0 }
 0x62d   :  { %v1846_v32 = vadd.f32 %v2614_v33, %v1845_v43 }
 0x62f   :  { %v1849_v42 = vadd.f32 %v1846_v32, %v3059_v52 }
 0x631   :  { %1851 = vst [vmem:[#allocation14 + $0x8] sm:$0xff] %v1849_v42 }
 0x632   :  { %1864 = dma.vmem_to_hbm [thread:$0]  %s1857_s12, 256, %s1859_s15, [#allocation4], %s2868_s21, %s2868_s21, %s2869_s22  }
 0x633   :  { %2865 = dma.done.wait [#allocation4], 256  }
 0x634   :  { %2866 = vsyncadd [#allocation4], 4294967040 }
 0x635   :  { %1869 = vsyncpa [#allocation3], 1 }
 0x636   :  { %1870 = vsyncpa [#allocation6], 1 }
 0x637   :  { %1871 = vsyncpa [#allocation9], 1 }
 0x638   :  { %1872 = vsyncpa [#allocation12], 1 }
 0x639   :  { %1873 = vsyncpa [#allocation4], 1 }

</bundles_post_ra>
